<compile_context>
chip_gen: v5e
topology: v5e:2x2
jax: 0.10.0
libtpu: 0.0.40
codegen_flags: <defaults>
</compile_context>

<pallas_src>
import jax
import jax.numpy as jnp
import numpy as np
from jax.experimental import pallas as pl
from jax.experimental.pallas import tpu as pltpu

C_IN_PAD = 8     # xyz (3) padded to 8 lanes (block last dim == array dim is legal)
K_PAD = 128      # k output classes padded to a full lane width (unmasked vst)


def _round_up(a, m):
    return (a + m - 1) // m * m


# ----------------------------------------------------------------------------
# Kernels
# ----------------------------------------------------------------------------
def _encoder_kernel(x_ref, w1_ref, b1_ref, w2_ref, b2_ref, w3_ref, gmax_ref):
    """Pass 1: encoder on one point tile; running max-pool into gmax_ref.

    bn3's bias is NOT added here: a per-channel bias commutes past the
    per-channel max, so it is added once to the pooled vector in the wrapper
    (saves a (TN,1024) f32 broadcast-add per tile and one operand DMA).
    """
    n = pl.program_id(2)
    x = x_ref[0].astype(jnp.bfloat16)                                   # (TN, 8)

    h1 = jnp.dot(x, w1_ref[...], preferred_element_type=jnp.float32) + b1_ref[...]
    h1 = jnp.maximum(h1, 0.0)                                           # relu(bn1(conv1)) (TN,64)
    h2 = jnp.dot(h1.astype(jnp.bfloat16), w2_ref[...],
                 preferred_element_type=jnp.float32) + b2_ref[...]
    h2 = jnp.maximum(h2, 0.0)                                           # relu(bn2(conv2)) (TN,128)
    h3 = jnp.dot(h2.astype(jnp.bfloat16), w3_ref[...],
                 preferred_element_type=jnp.float32)                    # bn3(conv3) minus bias (TN,1024)

    tile_max = jnp.max(h3, axis=0, keepdims=True)                       # (1, 1024)

    @pl.when(n == 0)
    def _():
        gmax_ref[0, 0] = tile_max

    @pl.when(n != 0)
    def _():
        gmax_ref[0, 0] = jnp.maximum(gmax_ref[0, 0], tile_max)


def _seg_head_kernel(x_ref, gvec_ref, w1_ref, b1_ref, w5p_ref,
                     w6_ref, b6_ref, w7_ref, b7_ref, w8_ref, b8_ref, o_ref):
    """Pass 2: segmentation head on one point tile (global term precomputed).

    concat([global(1024), pointfeat(64)]) @ W5 == g @ W5[:1024] + h1 @ W5[1024:].
    The per-batch global part (gvec, incl. b5) arrives as an input block, so
    there is no cross-tile state and the point axis can be "parallel".
    """
    x = x_ref[0].astype(jnp.bfloat16)                                   # (TN, 8)
    h1 = jnp.dot(x, w1_ref[...], preferred_element_type=jnp.float32) + b1_ref[...]
    h1 = jnp.maximum(h1, 0.0)                                           # pointfeat (TN, 64)

    s1 = jnp.dot(h1.astype(jnp.bfloat16), w5p_ref[...],
                 preferred_element_type=jnp.float32) + gvec_ref[0]      # + (1,512) global term
    s1 = jnp.maximum(s1, 0.0)                                           # (TN, 512)
    s2 = jnp.dot(s1.astype(jnp.bfloat16), w6_ref[...],
                 preferred_element_type=jnp.float32) + b6_ref[...]
    s2 = jnp.maximum(s2, 0.0)                                           # (TN, 256)
    s3 = jnp.dot(s2.astype(jnp.bfloat16), w7_ref[...],
                 preferred_element_type=jnp.float32) + b7_ref[...]
    s3 = jnp.maximum(s3, 0.0)                                           # (TN, 128)
    logits = jnp.dot(s3.astype(jnp.bfloat16), w8_ref[...],
                     preferred_element_type=jnp.float32) + b8_ref[...]  # (TN, K_PAD)

    # Padded class lanes carry a -1e30 bias (w8's padded columns are zero), so
    # exp(-1e30 - m) == 0 and no iota/where mask is needed.  NOTE: those lanes
    # therefore hold ~ -1e30 in the padded output; the wrapper slices them off.
    m = jnp.max(logits, axis=-1, keepdims=True)
    lse = m + jnp.log(jnp.sum(jnp.exp(logits - m), axis=-1, keepdims=True))
    o_ref[0] = (logits - lse).astype(o_ref.dtype)                       # bf16 store


# ----------------------------------------------------------------------------
# Wrapper
# ----------------------------------------------------------------------------
def _pick_point_tile(n, target=1024):
    """Point tile: big (amortizes ~0.35us/grid-step), 128-aligned, low tail waste."""
    if n <= 128:
        return max(16, _round_up(n, 16))
    best = None
    for t in range(128, min(target, _round_up(n, 128)) + 1, 128):
        waste = _round_up(n, t) - n
        if best is None or waste < best[0] or (waste == best[0] and t > best[1]):
            best = (waste, t)
    return best[1]


def _vmem_limit_bytes():
    """~3/4 of physical VMEM: ≈48 MiB on v7x (64 MiB), ≈96 MiB on v5e/v6e (128 MiB)."""
    try:
        cap = int(pltpu.get_tpu_info().vmem_capacity_bytes)
    except Exception:  # query unavailable in this build -> assume the smallest (v7x)
        cap = 64 << 20
    return max(32 << 20, min(cap * 3 // 4, 100 << 20))


def _nbytes(arrs):
    return sum(int(np.prod(a.shape)) * a.dtype.itemsize for a in arrs)


def _forward(x, params, tn):
    B, N, _ = x.shape
    n_pad = _round_up(N, tn)
    nt = n_pad // tn
    split = 2 if nt % 2 == 0 else 1          # megacore point-split for pass 1 (v7x)
    nt_s = nt // split

    # Tail-pad the point axis by replicating the last real point (harmless for
    # the global max-pool; padded rows are sliced off), then pad xyz -> 8 lanes.
    if n_pad != N:
        tail = jnp.broadcast_to(x[:, -1:, :], (B, n_pad - N, 3))
        x = jnp.concatenate([x, tail], axis=1)
    xp = jnp.pad(x, ((0, 0), (0, 0), (0, C_IN_PAD - 3)))

    vmem_limit = _vmem_limit_bytes()

    # ---- pass 1: encoder + partial global max pool -> (B, split, 1, 1024) ----
    enc_w = [params["w1"], params["b1"], params["w2"], params["b2"], params["w3"]]
    cost1 = pl.CostEstimate(
        flops=2 * B * n_pad * (C_IN_PAD * 64 + 64 * 128 + 128 * 1024),
        transcendentals=0,
        bytes_accessed=B * n_pad * C_IN_PAD * 4 + _nbytes(enc_w) + B * split * 1024 * 4,
    )
    gmax = pl.pallas_call(
        _encoder_kernel,
        out_shape=jax.ShapeDtypeStruct((B, split, 1, 1024), jnp.float32),
        grid_spec=pltpu.PrefetchScalarGridSpec(
            num_scalar_prefetch=0,
            grid=(B, split, nt_s),
            in_specs=[pl.BlockSpec((1, tn, C_IN_PAD),
                                   lambda b, s, n: (b, s * nt_s + n, 0))]
                     + [pl.BlockSpec(w.shape, lambda b, s, n: (0, 0)) for w in enc_w],
            out_specs=pl.BlockSpec((1, 1, 1, 1024), lambda b, s, n: (b, s, 0, 0)),
        ),
        compiler_params=pltpu.CompilerParams(
            dimension_semantics=("parallel", "parallel", "arbitrary"),
            vmem_limit_bytes=vmem_limit),
        cost_estimate=cost1,
    )(xp, *enc_w)

    # ---- tiny wrapper glue: combine partial maxes, fold b3, hoist g @ W5g ----
    rnd = lambda a: a.astype(jnp.bfloat16).astype(jnp.float32)
    g = jnp.max(gmax, axis=(1, 2)) + params["b3"]                        # (B, 1024)
    gvec = (jnp.einsum("bc,cd->bd", rnd(g), params["w5g"].astype(jnp.float32))
            + params["b5"]).reshape(B, 1, 512)                           # (B, 1, 512)

    # ---- pass 2: segmentation head -> (B, n_pad, K_PAD) bf16 log-probs ----
    seg_w = [params["w1"], params["b1"], params["w5p"],
             params["w6"], params["b6"], params["w7"], params["b7"],
             params["w8"], params["b8"]]
    cost2 = pl.CostEstimate(
        flops=2 * B * n_pad * (C_IN_PAD * 64 + 64 * 512 + 512 * 256
                               + 256 * 128 + 128 * K_PAD),
        transcendentals=B * n_pad * (K_PAD + 1),
        bytes_accessed=(B * n_pad * C_IN_PAD * 4 + B * 512 * 4
                        + _nbytes(seg_w) + B * n_pad * K_PAD * 2),
    )
    out = pl.pallas_call(
        _seg_head_kernel,
        out_shape=jax.ShapeDtypeStruct((B, n_pad, K_PAD), jnp.bfloat16),
        grid_spec=pltpu.PrefetchScalarGridSpec(
            num_scalar_prefetch=0,
            grid=(B, nt),
            in_specs=[pl.BlockSpec((1, tn, C_IN_PAD), lambda b, n: (b, n, 0)),
                      pl.BlockSpec((1, 1, 512), lambda b, n: (b, 0, 0))]
                     + [pl.BlockSpec(w.shape, lambda b, n: (0, 0)) for w in seg_w],
            out_specs=pl.BlockSpec((1, tn, K_PAD), lambda b, n: (b, n, 0)),
        ),
        compiler_params=pltpu.CompilerParams(
            dimension_semantics=("parallel", "parallel"),
            vmem_limit_bytes=vmem_limit),
        cost_estimate=cost2,
    )(xp, gvec, *seg_w)
    return out, n_pad


def pointnet_partseg_cls(x, params, k, tn=None):
    """x: (B, N, 3) float32 point cloud. Returns (B, N, k) float32 log-probs."""
    _, N, _ = x.shape
    if tn is None:
        tn = _pick_point_tile(N)
    assert tn % 8 == 0, "point tile must be a multiple of 8"

    out, _ = _forward(x, params, tn)
    # Slice off replicated tail points and the padded class lanes (those lanes
    # hold ~ -1e30, NOT zeros); return f32 for a stable downstream interface.
    return out[:, :N, :k].astype(jnp.float32)


# ----------------------------------------------------------------------------
# Deterministic parameter construction (PyTorch shapes, BN folded into conv).
# ----------------------------------------------------------------------------
def _conv_bn(key, cin, cout, with_bn=True, eps=1e-5):
    kw, kb, kg, kbe, km, kv = jax.random.split(key, 6)
    w = jax.random.normal(kw, (cin, cout), jnp.float32) * 0.1   # Conv1d weight^T
    b = jax.random.normal(kb, (cout,), jnp.float32) * 0.1       # Conv1d bias
    if with_bn:
        gamma = jax.random.uniform(kg, (cout,), jnp.float32, 0.5, 1.5)
        beta = jax.random.normal(kbe, (cout,), jnp.float32) * 0.1
        mean = jax.random.normal(km, (cout,), jnp.float32) * 0.1
        var = jax.random.uniform(kv, (cout,), jnp.float32, 0.5, 1.5)
        scale = gamma / jnp.sqrt(var + eps)
        w = w * scale[None, :]
        b = (b - mean) * scale + beta
    return w, b.reshape(1, cout)


def make_params(key, k):
    keys = jax.random.split(key, 7)
    w1, b1 = _conv_bn(keys[0], 3, 64)          # encoder conv1 + bn1
    w2, b2 = _conv_bn(keys[1], 64, 128)        # encoder conv2 + bn2
    w3, b3 = _conv_bn(keys[2], 128, 1024)      # encoder conv3 + bn3
    w5, b5 = _conv_bn(keys[3], 1088, 512)      # seg conv1 + bn1
    w6, b6 = _conv_bn(keys[4], 512, 256)       # seg conv2 + bn2
    w7, b7 = _conv_bn(keys[5], 256, 128)       # seg conv3 + bn3
    w8, b8 = _conv_bn(keys[6], 128, k, with_bn=False)  # seg conv4 (no BN)

    bf16 = lambda a: a.astype(jnp.bfloat16)

    # pad the xyz input rows of w1 to 8 and the k output columns of w8 to 128
    w1p = jnp.zeros((C_IN_PAD, 64), jnp.float32).at[:3, :].set(w1)
    w8p = jnp.zeros((128, K_PAD), jnp.float32).at[:, :k].set(w8)
    # padded class lanes get a -1e30 bias so they vanish from the softmax sum
    b8p = jnp.full((1, K_PAD), -1e30, jnp.float32).at[:, :k].set(b8)

    w5g, w5p = w5[:1024, :], w5[1024:, :]      # global / pointfeat split of the 1088->512 conv

    return {
        # kernel / wrapper operands (bf16 matmul weights, f32 biases)
        "w1": bf16(w1p), "b1": b1,
        "w2": bf16(w2), "b2": b2,
        "w3": bf16(w3), "b3": b3,              # b3 applied to the pooled max in the wrapper
        "w5g": bf16(w5g), "w5p": bf16(w5p), "b5": b5,
        "w6": bf16(w6), "b6": b6,
        "w7": bf16(w7), "b7": b7,
        "w8": bf16(w8p), "b8": b8p,
        # f32 originals for the pure-JAX reference
        "w1_f32": w1, "w2_f32": w2, "w3_f32": w3,
        "w5g_f32": w5g, "w5p_f32": w5p,
        "w6_f32": w6, "w7_f32": w7, "w8_f32": w8, "b8_f32": b8,
    }


def reference(x, p):
    """Pure-JAX reference of the PyTorch forward (BN folded).

    Emulates the kernel's bf16-operand / f32-accumulate matmuls (operands are
    rounded to bf16 before each contraction) so the comparison isolates kernel
    structure from the intentional bf16 precision choice.
    """
    rnd = lambda a: a.astype(jnp.bfloat16).astype(jnp.float32)
    mm = lambda a, w: jnp.einsum("bnc,cd->bnd", rnd(a), rnd(w))
    relu = jax.nn.relu

    h1 = relu(mm(x, p["w1_f32"]) + p["b1"])              # (B,N,64)
    h2 = relu(mm(h1, p["w2_f32"]) + p["b2"])             # (B,N,128)
    h3 = mm(h2, p["w3_f32"]) + p["b3"]                   # (B,N,1024)
    g = jnp.max(h3, axis=1, keepdims=True)               # (B,1,1024) global max pool
    gterm = mm(g, p["w5g_f32"]) + p["b5"]                # (B,1,512)
    s1 = relu(mm(h1, p["w5p_f32"]) + gterm)              # concat([g, pointfeat]) trick
    s2 = relu(mm(s1, p["w6_f32"]) + p["b6"])
    s3 = relu(mm(s2, p["w7_f32"]) + p["b7"])
    logits = mm(s3, p["w8_f32"]) + p["b8_f32"]           # (B,N,k)
    return jax.nn.log_softmax(logits, axis=-1)


if __name__ == "__main__":
    B, N, K = 2, 256, 4
    key = jax.random.PRNGKey(0)
    kx, kp, kx2 = jax.random.split(key, 3)
    x = jax.random.normal(kx, (B, N, 3), jnp.float32)
    params = make_params(kp, K)

    # tn=128 -> 2 point tiles per batch element: exercises the split partial-max
    # accumulation (pass 1) and the megacore-parallel point axis (pass 2).
    out = jax.block_until_ready(pointnet_partseg_cls(x, params, K, tn=128))
    ref = jax.block_until_ready(reference(x, params))
    np.testing.assert_allclose(np.asarray(out), np.asarray(ref), rtol=1e-2, atol=2e-2)
    assert out.shape == (B, N, K)

    # Non-divisible point count: exercises the replicate-last-point tail padding
    # (N=200 with tn=64 -> padded to 256, 4 tiles, split=2).
    N2 = 200
    x2 = jax.random.normal(kx2, (B, N2, 3), jnp.float32)
    out2 = jax.block_until_ready(pointnet_partseg_cls(x2, params, K, tn=64))
    ref2 = jax.block_until_ready(reference(x2, params))
    np.testing.assert_allclose(np.asarray(out2), np.asarray(ref2), rtol=1e-2, atol=2e-2)
    assert out2.shape == (B, N2, K)

    print("KERNEL_OK")
</pallas_src>

<mosaic_0001>
module attributes {stable_mosaic.version = 11 : i64} {
  func.func @_encoder_kernel(%arg0: i32, %arg1: i32, %arg2: i32, %arg3: memref<1x128x8xf32, #tpu.memory_space<vmem>>, %arg4: memref<8x64xbf16, #tpu.memory_space<vmem>>, %arg5: memref<1x64xf32, #tpu.memory_space<vmem>>, %arg6: memref<64x128xbf16, #tpu.memory_space<vmem>>, %arg7: memref<1x128xf32, #tpu.memory_space<vmem>>, %arg8: memref<128x1024xbf16, #tpu.memory_space<vmem>>, %arg9: memref<1x1x1x1024xf32, #tpu.memory_space<vmem>>) attributes {dimension_semantics = [#tpu.dimension_semantics<parallel>, #tpu.dimension_semantics<parallel>, #tpu.dimension_semantics<arbitrary>], iteration_bounds = array<i64: 2, 2, 1>, scalar_prefetch = 0 : i64, scratch_operands = 0 : i64, tpu.core_type = #tpu.core_type<tc>, window_params = [{transform_indices = @transform_0, window_bounds = array<i64: 1, 128, 8>}, {pipeline_mode = #tpu.pipeline_mode<synchronous>, transform_indices = @transform_1, window_bounds = array<i64: 8, 64>}, {pipeline_mode = #tpu.pipeline_mode<synchronous>, transform_indices = @transform_2, window_bounds = array<i64: 1, 64>}, {pipeline_mode = #tpu.pipeline_mode<synchronous>, transform_indices = @transform_3, window_bounds = array<i64: 64, 128>}, {pipeline_mode = #tpu.pipeline_mode<synchronous>, transform_indices = @transform_4, window_bounds = array<i64: 1, 128>}, {pipeline_mode = #tpu.pipeline_mode<synchronous>, transform_indices = @transform_5, window_bounds = array<i64: 128, 1024>}, {transform_indices = @transform_6, window_bounds = array<i64: 1, 1, 1, 1024>}]} {
    %c0 = arith.constant 0 : index
    %c0_0 = arith.constant 0 : index
    %c0_1 = arith.constant 0 : index
    %0 = vector.load %arg3[%c0, %c0_0, %c0_1] : memref<1x128x8xf32, #tpu.memory_space<vmem>>, vector<1x128x8xf32>
    %1 = vector.shape_cast %0 : vector<1x128x8xf32> to vector<128x8xf32>
    %2 = arith.truncf %1 : vector<128x8xf32> to vector<128x8xbf16>
    %c0_2 = arith.constant 0 : index
    %c0_3 = arith.constant 0 : index
    %3 = vector.load %arg4[%c0_2, %c0_3] : memref<8x64xbf16, #tpu.memory_space<vmem>>, vector<8x64xbf16>
    %cst = arith.constant dense<0.000000e+00> : vector<128x64xf32>
    %4 = tpu.matmul %2, %3, %cst {dimension_numbers = #tpu.dot_dimension_numbers<[1], [0], [0], [1], [0, 0, 1, 1], [], []>} : vector<128x8xbf16>, vector<8x64xbf16>, vector<128x64xf32> -> vector<128x64xf32>
    %c0_4 = arith.constant 0 : index
    %c0_5 = arith.constant 0 : index
    %5 = vector.load %arg5[%c0_4, %c0_5] : memref<1x64xf32, #tpu.memory_space<vmem>>, vector<1x64xf32>
    %6 = vector.broadcast %5 : vector<1x64xf32> to vector<128x64xf32>
    %7 = arith.addf %4, %6 : vector<128x64xf32>
    %cst_6 = arith.constant 0.000000e+00 : f32
    %8 = vector.broadcast %cst_6 : f32 to vector<128x64xf32>
    %9 = arith.maximumf %7, %8 : vector<128x64xf32>
    %10 = arith.truncf %9 : vector<128x64xf32> to vector<128x64xbf16>
    %c0_7 = arith.constant 0 : index
    %c0_8 = arith.constant 0 : index
    %11 = vector.load %arg6[%c0_7, %c0_8] : memref<64x128xbf16, #tpu.memory_space<vmem>>, vector<64x128xbf16>
    %cst_9 = arith.constant dense<0.000000e+00> : vector<128x128xf32>
    %12 = tpu.matmul %10, %11, %cst_9 {dimension_numbers = #tpu.dot_dimension_numbers<[1], [0], [0], [1], [0, 0, 1, 1], [], []>} : vector<128x64xbf16>, vector<64x128xbf16>, vector<128x128xf32> -> vector<128x128xf32>
    %c0_10 = arith.constant 0 : index
    %c0_11 = arith.constant 0 : index
    %13 = vector.load %arg7[%c0_10, %c0_11] : memref<1x128xf32, #tpu.memory_space<vmem>>, vector<1x128xf32>
    %14 = vector.broadcast %13 : vector<1x128xf32> to vector<128x128xf32>
    %15 = arith.addf %12, %14 : vector<128x128xf32>
    %cst_12 = arith.constant 0.000000e+00 : f32
    %16 = vector.broadcast %cst_12 : f32 to vector<128x128xf32>
    %17 = arith.maximumf %15, %16 : vector<128x128xf32>
    %18 = arith.truncf %17 : vector<128x128xf32> to vector<128x128xbf16>
    %c0_13 = arith.constant 0 : index
    %c0_14 = arith.constant 0 : index
    %19 = vector.load %arg8[%c0_13, %c0_14] : memref<128x1024xbf16, #tpu.memory_space<vmem>>, vector<128x1024xbf16>
    %cst_15 = arith.constant dense<0.000000e+00> : vector<128x1024xf32>
    %20 = tpu.matmul %18, %19, %cst_15 {dimension_numbers = #tpu.dot_dimension_numbers<[1], [0], [0], [1], [0, 0, 1, 1], [], []>} : vector<128x128xbf16>, vector<128x1024xbf16>, vector<128x1024xf32> -> vector<128x1024xf32>
    %cst_16 = arith.constant dense<0xFF800000> : vector<1024xf32>
    %21 = vector.multi_reduction <maximumf>, %20, %cst_16 [0] : vector<128x1024xf32> to vector<1024xf32>
    %22 = vector.shape_cast %21 : vector<1024xf32> to vector<1x1024xf32>
    %c0_i32 = arith.constant 0 : i32
    %23 = arith.cmpi eq, %arg2, %c0_i32 : i32
    %24 = arith.extui %23 : i1 to i32
    %c0_i32_17 = arith.constant 0 : i32
    %25 = arith.cmpi ne, %24, %c0_i32_17 : i32
    scf.if %25 {
      %c0_20 = arith.constant 0 : index
      %c0_21 = arith.constant 0 : index
      %c0_22 = arith.constant 0 : index
      %c0_23 = arith.constant 0 : index
      %29 = vector.load %arg9[%c0_20, %c0_21, %c0_22, %c0_23] : memref<1x1x1x1024xf32, #tpu.memory_space<vmem>>, vector<1x1x1x1024xf32>
      %30 = vector.shape_cast %29 : vector<1x1x1x1024xf32> to vector<1x1024xf32>
      %31 = vector.shape_cast %22 : vector<1x1024xf32> to vector<1x1x1x1024xf32>
      tpu.vector_store %arg9[%c0_20, %c0_21, %c0_22, %c0_23], %31 {strides = array<i32>} : memref<1x1x1x1024xf32, #tpu.memory_space<vmem>>, vector<1x1x1x1024xf32>,
    } else {
    }
    %c0_i32_18 = arith.constant 0 : i32
    %26 = arith.cmpi ne, %arg2, %c0_i32_18 : i32
    %27 = arith.extui %26 : i1 to i32
    %c0_i32_19 = arith.constant 0 : i32
    %28 = arith.cmpi ne, %27, %c0_i32_19 : i32
    scf.if %28 {
      %c0_20 = arith.constant 0 : index
      %c0_21 = arith.constant 0 : index
      %c0_22 = arith.constant 0 : index
      %c0_23 = arith.constant 0 : index
      %29 = vector.load %arg9[%c0_20, %c0_21, %c0_22, %c0_23] : memref<1x1x1x1024xf32, #tpu.memory_space<vmem>>, vector<1x1x1x1024xf32>
      %30 = vector.shape_cast %29 : vector<1x1x1x1024xf32> to vector<1x1024xf32>
      %31 = arith.maximumf %30, %22 : vector<1x1024xf32>
      %c0_24 = arith.constant 0 : index
      %c0_25 = arith.constant 0 : index
      %c0_26 = arith.constant 0 : index
      %c0_27 = arith.constant 0 : index
      %32 = vector.load %arg9[%c0_24, %c0_25, %c0_26, %c0_27] : memref<1x1x1x1024xf32, #tpu.memory_space<vmem>>, vector<1x1x1x1024xf32>
      %33 = vector.shape_cast %32 : vector<1x1x1x1024xf32> to vector<1x1024xf32>
      %34 = vector.shape_cast %31 : vector<1x1024xf32> to vector<1x1x1x1024xf32>
      tpu.vector_store %arg9[%c0_24, %c0_25, %c0_26, %c0_27], %34 {strides = array<i32>} : memref<1x1x1x1024xf32, #tpu.memory_space<vmem>>, vector<1x1x1x1024xf32>,
    } else {
    }
    return
  }
  func.func @transform_0(%arg0: i32, %arg1: i32, %arg2: i32) -> (i32, i32, i32) {
    %c1_i32 = arith.constant 1 : i32
    %0 = arith.muli %arg1, %c1_i32 : i32
    %1 = arith.addi %0, %arg2 : i32
    %c0_i32 = arith.constant 0 : i32
    %c0_i32_0 = arith.constant 0 : i32
    return %arg0, %1, %c0_i32 : i32, i32, i32
  }
  func.func @transform_1(%arg0: i32, %arg1: i32, %arg2: i32) -> (i32, i32) {
    %c0_i32 = arith.constant 0 : i32
    %c0_i32_0 = arith.constant 0 : i32
    %c0_i32_1 = arith.constant 0 : i32
    return %c0_i32, %c0_i32_0 : i32, i32
  }
  func.func @transform_2(%arg0: i32, %arg1: i32, %arg2: i32) -> (i32, i32) {
    %c0_i32 = arith.constant 0 : i32
    %c0_i32_0 = arith.constant 0 : i32
    %c0_i32_1 = arith.constant 0 : i32
    return %c0_i32, %c0_i32_0 : i32, i32
  }
  func.func @transform_3(%arg0: i32, %arg1: i32, %arg2: i32) -> (i32, i32) {
    %c0_i32 = arith.constant 0 : i32
    %c0_i32_0 = arith.constant 0 : i32
    %c0_i32_1 = arith.constant 0 : i32
    return %c0_i32, %c0_i32_0 : i32, i32
  }
  func.func @transform_4(%arg0: i32, %arg1: i32, %arg2: i32) -> (i32, i32) {
    %c0_i32 = arith.constant 0 : i32
    %c0_i32_0 = arith.constant 0 : i32
    %c0_i32_1 = arith.constant 0 : i32
    return %c0_i32, %c0_i32_0 : i32, i32
  }
  func.func @transform_5(%arg0: i32, %arg1: i32, %arg2: i32) -> (i32, i32) {
    %c0_i32 = arith.constant 0 : i32
    %c0_i32_0 = arith.constant 0 : i32
    %c0_i32_1 = arith.constant 0 : i32
    return %c0_i32, %c0_i32_0 : i32, i32
  }
  func.func @transform_6(%arg0: i32, %arg1: i32, %arg2: i32) -> (i32, i32, i32, i32) {
    %c0_i32 = arith.constant 0 : i32
    %c0_i32_0 = arith.constant 0 : i32
    %c0_i32_1 = arith.constant 0 : i32
    return %arg0, %arg1, %c0_i32, %c0_i32_0 : i32, i32, i32, i32
  }
}

</mosaic_0001>

<bundles_post_ra>
// kernel: tpu_custom_call.1
= control target key start
LH: loop header
LB: loop body
LE: loop exit
PB: predicated region body
PF: predicated region fallthrough
CT: control target
= control target key end

     0   :  { %11 = vsyncpa [#allocation3], 0  ;;  %s3136_s0 = inlined_call_operand.vmem [shape: f32[2,256,8], index: 0, kind: input, shape index: {}]   ;;  %s3137_s1 = inlined_call_operand.vmem [shape: bf16[8,64], index: 1, kind: input, shape index: {}]   ;;  %s3138_s2 = inlined_call_operand.hbm [shape: f32[1,64], index: 2, kind: input, shape index: {}]   ;;  %s3139_s3 = inlined_call_operand.vmem [shape: bf16[64,128], index: 3, kind: input, shape index: {}]   ;;  %s3140_s4 = inlined_call_operand.hbm [shape: f32[1,128], index: 4, kind: input, shape index: {}]   ;;  %s3141_s5 = inlined_call_operand.vmem [shape: bf16[128,1024], index: 5, kind: input, shape index: {}]   ;;  %s3142_s6 = inlined_call_operand.hbm [shape: f32[2,2,1,1024], index: 6, kind: output, shape index: {}]  }
   0x1   :  { %12 = vsyncpa [#allocation6], 0 }
   0x2   :  { %13 = vsyncpa [#allocation4], 0 }
   0x3   :  { %15 = vsyncpa [#allocation4 + $0x1], 0  ;;  %s2407_s21 = smov 0   ;;  %s2409_s22 = smov 0  }
   0x4   :  { %s2411_s23 = smov 0   ;;  %s2413_s24 = smov 0  }
   0x5   :  { %s2415_s25 = smov 0   ;;  %s2417_s26 = smov 0  }
   0x6   :  { %s2419_s27 = smov 0   ;;  %s2421_s28 = smov 0  }
   0x7 LB: > { %s1725_s29 = sadd.s32 4294967295, %s2368_s28   ;;  %s1726_s30 = sadd.s32 4294967294, %s2368_s28   ;;  %s2368_s28 = sphi %s2421_s28, %s21_s28   ;;  %s2364_s27 = sphi %s2419_s27, %s3159_s27   ;;  %s2360_s26 = sphi %s2417_s26, %s3158_s26   ;;  %s2356_s25 = sphi %s2415_s25, %s3157_s25   ;;  %s2352_s24 = sphi %s2413_s24, %s3156_s24   ;;  %s2348_s23 = sphi %s2411_s23, %s3155_s23   ;;  %s2344_s22 = sphi %s2409_s22, %s3154_s22   ;;  %s2340_s21 = sphi %s2407_s21, %s3153_s21  }
   0x8   : > { %s36_s7 = sadd.s32 1, %s2360_s26  ;;  %s40_s8 = sadd.s32 1, %s2364_s27 }
   0x9   : > { %p38_p0 = scmp.ge.s32.totalorder %s36_s7, 2  ;;  %s184_s9 = sadd.s32 1, %s2348_s23 }
   0xa   : > { %p194_p1 = scmp.ne.s32.totalorder %s2348_s23, %s2344_s22  ;;  %p195_p2 = scmp.eq.s32.totalorder %s1725_s29, 3 }
   0xb   : > { %s3161_s7 = smov (%p38_p0, %s36_s7), 0  ;;  %s3163_s8 = smov (!%p38_p0, %s40_s8), %s2364_s27 }
   0xc   : > { %3145 = sst [smem:[#allocation11_spill]] %s3161_s7  ;;  %s180_s10 = ssub.s32 %s2360_s26, %s3161_s7 }
   0xd   : > { %p2459_p3 = por %p195_p2, %p194_p1  ;;  %p42_p4 = scmp.ge.s32.totalorder %s3163_s8, 2 }
   0xe   : > { %p200_p5 = scmp.ne.s32.totalorder %s2344_s22, %s2340_s21  ;;  %p201_p6 = scmp.eq.s32.totalorder %s1726_s30, 3 }
   0xf   : > { %p1727_p7 = scmp.ge.s32.totalorder %s2368_s28, 1  ;;  %s3165_s8 = smov (%p42_p4, %s3163_s8), 0 }
  0x10   : > { %3147 = sst [smem:[#allocation12_spill]] %s3165_s8  ;;  %p2468_p8 = por %p201_p6, %p200_p5 }
  0x11   : > { %p208_p9 = scmp.lt.s32.totalorder %s2368_s28, 5  ;;  %s179_s13 = ssub.s32 %s2364_s27, %s3165_s8 }
  0x12   : > { %s181_s14 = sor.u32 %s180_s10, %s179_s13  ;;  %p2479_p12 = scmp.eq.s32.totalorder %s1725_s29, 0 }
  0x13   : > { %p2475_p10 = pnand %p1727_p7, %p208_p9  ;;  %p182_p11 = scmp.eq.s32.totalorder %s181_s14, 0 }
  0x14   : > { %s223_s19 = sshll.u32 %s3138_s2, 4  ;;  %s2370_s30 = smov [#allocation2]   ;;  %s224_s19 = int_to_ptr.hbm [resolvable:$true] %s223_s19 }
  0x15   : > { %p2122_p13 = pneg %p2475_p10  ;;  %s225_s10 = sshll.u32 %s2370_s30, 4  ;;  %s226_s10 = int_to_ptr.vmem [resolvable:$true] %s225_s10 }
  0x16   : > { %s2489_s20 = scalar_select %p182_p11, %s2348_s23, %s184_s9  }
  0x17   : > { %p2123_p0 = pnand %p2479_p12, %p2122_p13  ;;  %s238_s14 = sshll.u32 %s3140_s4, 4  ;;  %s239_s14 = int_to_ptr.hbm [resolvable:$true] %s238_s14 }
  0x18   : > { %s2371_s8 = smov [#allocation5]   ;;  %271 = sbr.rel (%p2475_p10) target bundleno = 741 (0x2e5), region = 44 }
  0x19   : > { %2125 = dma.hbm_to_vmem [thread:$0]  (!%p2123_p0), %s224_s19, 16, %s226_s10, [#allocation3]  }
  0x1a   : > { %s240_s7 = sshll.u32 %s2371_s8, 4  ;;  %s241_s7 = int_to_ptr.vmem [resolvable:$true] %s240_s7 }
  0x1b   : > { %2128 = dma.hbm_to_vmem [thread:$0]  (!%p2123_p0), %s239_s14, 16, %s241_s7, [#allocation6]  }
  0x1d   : > { %2327 = dma.done.wait (%p2479_p12), [#allocation3], 16  }
  0x1e   : > { %2329 = vsyncadd (%p2479_p12), [#allocation3], 4294967280 }
  0x1f   : > { %2331 = dma.done.wait (%p2479_p12), [#allocation6], 16  }
  0x20   : > { %2333 = vsyncadd (%p2479_p12), [#allocation6], 4294967280  ;;  %s1735_s8 = sshll.u32 %s2352_s24, 4  ;;  %p314_p1 = scmp.lt.s32.totalorder %s2356_s25, 1  ;;  %vm379_vm0 = vcmask 1043456   ;;  %vm354_vm1 = vcmask 64512  }
  0x21   : > { %p316_p2 = scmp.lt.s32.totalorder %s1735_s8, 31  ;;  %v349_v0 = vld [vmem:[%s3137_s1] sm:$0xf]  ;;  %v2034_v26 = vld [vmem:[%s3139_s3 + $0x18] sm:$0xff]  ;;  %v2033_v27 = vld [vmem:[%s3139_s3 + $0x10] sm:$0xff]  ;;  %vm492_vm2 = vcmask 523264  }
  0x22   : > { %s315_s7 = scalar_select %p314_p1, %s2356_s25, 1  ;;  %v381_v1 = vsel %vm379_vm0, %v349_v0, 0  ;;  %521 = vmatpush.bf16.msra.mxu1 %v2034_v26  ;;  %2100 = vmatpush.bf16.msra.mxu2 %v2034_v26  ;;  %v2032_v28 = vld [vmem:[%s3139_s3 + $0x8] sm:$0xff]  ;;  %v2031_v29 = vld [vmem:[%s3139_s3] sm:$0xff]  ;;  %vm1555_vm3 = vcmask 1042434   ;;  %vm1553_vm4 = vcmask 1040384  }
  0x23   : > { %s3167_s8 = smov (!%p316_p2, %s1735_s8), 31  ;;  %390 = vmatpush.bf16.msra.mxu0 %v381_v1  ;;  %2099 = vmatpush.bf16.msra.mxu3 %v381_v1  ;;  %v2554_v31 = vld [vmem:[#allocation2] ss:$0 sm:$0xff]  ;;  %v2004_v61 = vld [vmem:[%s3141_s5 + $0x1c8] sm:$0xf]  ;;  %vm1557_vm5 = vcmask 1041408  }
  0x24   : > { %s1736_s9 = sshll.u32 %s315_s7, 5  ;;  %v2096_v62 = vld [vmem:[%s3141_s5 + $0x1e4] sm:$0xf0]  ;;  %v2091_v63 = vld [vmem:[%s3141_s5 + $0x1c4] sm:$0xf]  ;;  %vm1559_vm6 = vcmask 1044484  }
  0x25   : > { %s319_s15 = sadd.s32 %s1736_s9, %s3167_s8  ;;  %v2005_v1 = vor.u32 %v2096_v62, %v2004_v61  ;;  %v2071_v61 = vld [vmem:[%s3141_s5 + $0x11c] sm:$0xf0]  ;;  %s309_s7 = sand.u32 1, %s2344_s22   ;;  %vm1561_vm7 = vcmask 1046534   ;;  %vm1563_vm8 = vcmask 1045508  }
  0x26   : > { %s1737_s17 = sshll.u32 %s319_s15, 3  ;;  %522 = vmatpush.bf16.msra.mxu1 %v2033_v27  ;;  %2101 = vmatpush.bf16.msra.mxu2 %v2033_v27  ;;  %s2027_s9 = sshll.u32 %s2352_s24, 3 }
  0x27   : > { %s2515_s16 = scalar_lea.vmem %s3136_s0, %s1737_s17  ;;  %1072 = vmatpush.bf16.msrb.mxu0 %v2005_v1  ;;  %s2028_s15 = sshll.u32 %s2356_s25, 4 }
  0x28   : > { %v325_v2 = vld [vmem:[%s2515_s16] sm:$0xff]  ;;  %v326_v3 = vld [vmem:[%s2515_s16 + $0x8] sm:$0xff]  ;;  %v327_v5 = vld [vmem:[%s2515_s16 + $0x10] sm:$0xff]  ;;  %s1734_s17 = sshll.u32 %s309_s7, 3  ;;  %s1616_s18 = sadd.s32 %s2028_s15, %s2027_s9 }
  0x29   : > { %v341_v4 = vpack.c.bf16 %v326_v3, %v325_v2  ;;  %v328_v6 = vld [vmem:[%s2515_s16 + $0x18] sm:$0xff]  ;;  %v335_v8 = vld [vmem:[%s2515_s16 + $0x50] sm:$0xff]  ;;  %v329_v11 = vld [vmem:[%s2515_s16 + $0x20] sm:$0xff]  ;;  %s1617_s10 = scalar_lea.hbm %s3142_s6, %s1616_s18  ;;  %s1605_s13 = scalar_lea.sflag [#allocation4], %s309_s7 }
  0x2a   : > { %v342_v7 = vpack.c.bf16 %v328_v6, %v327_v5  ;;  %v336_v9 = vld [vmem:[%s2515_s16 + $0x58] sm:$0xff]  ;;  %v330_v12 = vld [vmem:[%s2515_s16 + $0x28] sm:$0xff]  ;;  %v337_v14 = vld [vmem:[%s2515_s16 + $0x60] sm:$0xff]  ;;  %523 = vmatpush.bf16.msra.mxu1 %v2032_v28  ;;  %2102 = vmatpush.bf16.msra.mxu2 %v2032_v28  ;;  %s1621_s25 = sshll.u32 %s1617_s10, 4  ;;  %s2286_s15 = scalar_lea.hbm %s3142_s6, 32  ;;  %s1622_s25 = int_to_ptr.hbm [resolvable:$true] %s1621_s25 }
  0x2b   : > { %1738 = vmatmul.msk.bf16.vlgmr.msra.gmra.mxu0 %vm354_vm1, %v341_v4  ;;  %v346_v10 = vpack.c.bf16 %v336_v9, %v335_v8  ;;  %v343_v13 = vpack.c.bf16 %v330_v12, %v329_v11  ;;  %v338_v15 = vld [vmem:[%s2515_s16 + $0x68] sm:$0xff]  ;;  %v331_v17 = vld [vmem:[%s2515_s16 + $0x30] sm:$0xff]  ;;  %v332_v18 = vld [vmem:[%s2515_s16 + $0x38] sm:$0xff]  ;;  %s2280_s29 = sshra.s32 %s1622_s25, 4  ;;  %s2281_s29 = int_to_ptr.hbm [resolvable:$true] %s2280_s29 }
  0x2c   : > { %v347_v16 = vpack.c.bf16 %v338_v15, %v337_v14  ;;  %v344_v19 = vpack.c.bf16 %v332_v18, %v331_v17  ;;  %v339_v20 = vld [vmem:[%s2515_s16 + $0x70] sm:$0xff]  ;;  %v340_v21 = vld [vmem:[%s2515_s16 + $0x78] sm:$0xff]  ;;  %v333_v23 = vld [vmem:[%s2515_s16 + $0x40] sm:$0xff]  ;;  %s2282_s14 = scalar_lea.hbm %s2281_s29, 8  ;;  %p2287_p7 = scmp.lt.s32.totalorder %s2281_s29, %s3142_s6 }
  0x2d   : > { %1743 = vmatmul.msk.bf16.vlgmr.msra.gmra.mxu3 %vm354_vm1, %v346_v10  ;;  %v348_v22 = vpack.c.bf16 %v340_v21, %v339_v20  ;;  %v334_v24 = vld [vmem:[%s2515_s16 + $0x48] sm:$0xff]  ;;  %v1998_v2 = vld [vmem:[%s3141_s5 + $0x1e0] sm:$0xf0]  ;;  %s311_s16 = scalar_lea.vmem [#allocation7], %s1734_s17  ;;  %p2283_p4 = scmp.ne.s32.totalorder %s2281_s29, %s2282_s14 }
  0x2e   : > { %v345_v25 = vpack.c.bf16 %v334_v24, %v333_v23  ;;  %524 = vmatpush.bf16.msra.mxu1 %v2031_v29  ;;  %2103 = vmatpush.bf16.msra.mxu2 %v2031_v29  ;;  %v1972_v3 = vld [vmem:[%s3141_s5 + $0x188] sm:$0xf]  ;;  %v2001_v5 = vor.u32 %v2091_v63, %v1998_v2  ;;  %v2092_v6 = vld [vmem:[%s3141_s5 + $0x1cc] sm:$0xf]  ;;  %v2083_v8 = vld [vmem:[%s3141_s5 + $0x184] sm:$0xf]  ;;  %p2288_p9 = scmp.lt.s32.totalorder %s2286_s15, %s2282_s14 }
  0x2f   : > { %v2088_v4 = vld [vmem:[%s3141_s5 + $0x1a4] sm:$0xf0]  ;;  %v2075_v18 = vld [vmem:[%s3141_s5 + $0x144] sm:$0xf]  ;;  %v2084_v20 = vld [vmem:[%s3141_s5 + $0x18c] sm:$0xf]  ;;  %p2284_p5 = pnand %p2283_p4, %p2459_p3 }
  0x30   : > { %v1973_v11 = vor.u32 %v2088_v4, %v1972_v3  ;;  %v1940_v14 = vld [vmem:[%s3141_s5 + $0x148] sm:$0xf]  ;;  %1023 = vmatpush.bf16.msrb.mxu3 %v2001_v5  ;;  %v1974_v21 = vld [vmem:[%s3141_s5 + $0x1a8] sm:$0xf0]  ;;  %v2051_v3 = vld [vmem:[%s3141_s5 + $0x84] sm:$0xf]  ;;  %p2289_p10 = por %p2288_p9, %p2287_p7 }
  0x31   : > { %v2080_v17 = vld [vmem:[%s3141_s5 + $0x164] sm:$0xf0]  ;;  %v1977_v24 = vor.u32 %v2084_v20, %v1974_v21  ;;  %v1838_v4 = vld [vmem:[%s3141_s5 + $0xa0] sm:$0xf0]  ;;  %v1878_v20 = vld [vmem:[%s3141_s5 + $0xe8] sm:$0xf0]  ;;  %p2285_p6 = pneg %p2284_p5 }
  0x32   : > { %1073 = vmatpush.bf16.msrb.mxu0 %v1973_v11  ;;  %v1941_v26 = vor.u32 %v2080_v17, %v1940_v14  ;;  %v1908_v28 = vld [vmem:[%s3141_s5 + $0x108] sm:$0xf]  ;;  %v1868_v17 = vld [vmem:[%s3141_s5 + $0xc0] sm:$0xf]  ;;  %s1619_s24 = sshll.u32 %s311_s16, 4  ;;  %s1620_s24 = int_to_ptr.vmem [resolvable:$true] %s1619_s24 }
  0x33   : > { %v2072_v29 = vld [vmem:[%s3141_s5 + $0x124] sm:$0xf0]  ;;  %p2290_p11 = pnand %p2289_p10, %p2285_p6 }
  0x36   : > { %1074 = vmatpush.bf16.msrb.mxu0 %v1941_v26  ;;  %v2056_v26 = vld [vmem:[%s3141_s5 + $0xa4] sm:$0xf0] }
  0x3b   : > { %1739 = vmatmul.msk.bf16.gmra.mxu0 %vm354_vm1, %v342_v7  ;;  %v2006_v7 = vld [vmem:[%s3141_s5 + $0x1e8] sm:$0xf0] }
  0x3c   : > { %v2009_v12 = vor.u32 %v2092_v6, %v2006_v7 }
  0x3d   : > { %1744 = vmatmul.msk.bf16.gmra.mxu3 %vm354_vm1, %v347_v16 }
  0x3e   : > { %1121 = vmatpush.bf16.msrb.mxu1 %v2009_v12 }
  0x42   : > { %1122 = vmatpush.bf16.msrb.mxu1 %v1977_v24  ;;  %v1844_v24 = vld [vmem:[%s3141_s5 + $0x88] sm:$0xf] }
  0x4b   : > { %1740 = vmatmul.msk.bf16.gmra.mxu0 %vm354_vm1, %v343_v13  ;;  %v1966_v13 = vld [vmem:[%s3141_s5 + $0x1a0] sm:$0xf0] }
  0x4c   : > { %v1969_v16 = vor.u32 %v2083_v8, %v1966_v13  ;;  %v1841_v8 = vor.u32 %v2051_v3, %v1838_v4  ;;  %v2020_v3 = vld [vmem:[%s3141_s5 + $0x1d8] sm:$0xf] }
  0x4d   : > { %1745 = vmatmul.msk.bf16.gmra.mxu3 %vm354_vm1, %v348_v22  ;;  %v1996_v22 = vld [vmem:[%s3141_s5 + $0x1c0] sm:$0xf]  ;;  %v2098_v4 = vld [vmem:[%s3141_s5 + $0x1f4] sm:$0xf0] }
  0x4e   : > { %1024 = vmatpush.bf16.msrb.mxu3 %v1969_v16 }
  0x5b   : > { %1741 = vmatmul.msk.bf16.gmra.mxu0 %vm354_vm1, %v344_v19  ;;  %v1934_v19 = vld [vmem:[%s3141_s5 + $0x160] sm:$0xf0] }
  0x6b   : > { %1742 = vmatmul.msk.bf16.gmra.mxu0 %vm354_vm1, %v345_v25  ;;  %v2095_v25 = vld [vmem:[%s3141_s5 + $0x1dc] sm:$0xf0] }
  0x6c   : > { %v1997_v27 = vor.u32 %v2095_v25, %v1996_v22  ;;  %v1836_v22 = vld [vmem:[%s3141_s5 + $0x80] sm:$0xf] }
  0x6e   : > { %974 = vmatpush.bf16.msrb.mxu2 %v1997_v27  ;;  %v2052_v27 = vld [vmem:[%s3141_s5 + $0x8c] sm:$0xf] }
  0xa8   : > { %v392_v30 = vpop.f32.mrf.mxu0 }
  0xa9   : > { %v393_v32 = vadd.f32 %v2554_v31, %v392_v30 }
  0xab   : > { %v432_v35 = vmax.f32 %v393_v32, 0.0 }
  0xb0   : > { %v394_v33 = vpop.f32.mrf.mxu0  ;;  %v417_v42 = vpop.f32.mrf.mxu3 }
  0xb1   : > { %v395_v34 = vadd.f32 %v2554_v31, %v394_v33  ;;  %v418_v46 = vadd.f32 %v2554_v31, %v417_v42  ;;  %v1937_v33 = vor.u32 %v2075_v18, %v1934_v19  ;;  %v2063_v18 = vld [vmem:[%s3141_s5 + $0xdc] sm:$0xf0]  ;;  %v2060_v19 = vld [vmem:[%s3141_s5 + $0xcc] sm:$0xf] }
  0xb2   : > { %v1881_v21 = vor.u32 %v2060_v19, %v1878_v20  ;;  %v2094_v19 = vld [vmem:[%s3141_s5 + $0x1dc] sm:$0xf] }
  0xb3   : > { %v433_v36 = vmax.f32 %v395_v34, 0.0  ;;  %v442_v49 = vmax.f32 %v418_v46, 0.0  ;;  %v1964_v34 = vld [vmem:[%s3141_s5 + $0x180] sm:$0xf]  ;;  %1025 = vmatpush.bf16.msrb.mxu3 %v1937_v33 }
  0xb5   : > { %v448_v37 = vpack.c.bf16 %v433_v36, %v432_v35  ;;  %v2087_v35 = vld [vmem:[%s3141_s5 + $0x19c] sm:$0xf0]  ;;  %v2076_v36 = vld [vmem:[%s3141_s5 + $0x14c] sm:$0xf] }
  0xb7   : > { %1762 = vmatmul.msk.bf16.vlgmr.msra.gmra.mxu1 %vm492_vm2, %v448_v37 }
  0xb8   : > { %v397_v38 = vpop.f32.mrf.mxu0  ;;  %v419_v48 = vpop.f32.mrf.mxu3 }
  0xb9   : > { %v398_v39 = vadd.f32 %v2554_v31, %v397_v38  ;;  %v420_v50 = vadd.f32 %v2554_v31, %v419_v48  ;;  %v2067_v38 = vld [vmem:[%s3141_s5 + $0x104] sm:$0xf]  ;;  %v2068_v48 = vld [vmem:[%s3141_s5 + $0x10c] sm:$0xf] }
  0xbb   : > { %v434_v43 = vmax.f32 %v398_v39, 0.0  ;;  %v443_v51 = vmax.f32 %v420_v50, 0.0  ;;  %v1902_v39 = vld [vmem:[%s3141_s5 + $0x120] sm:$0xf0] }
  0xbd   : > { %v453_v53 = vpack.c.bf16 %v443_v51, %v442_v49  ;;  %v1910_v49 = vld [vmem:[%s3141_s5 + $0x128] sm:$0xf0] }
  0xbf   : > { %1767 = vmatmul.msk.bf16.vlgmr.msra.gmra.mxu2 %vm492_vm2, %v453_v53  ;;  %v2059_v53 = vld [vmem:[%s3141_s5 + $0xc4] sm:$0xf] }
  0xc0   : > { %v399_v40 = vpop.f32.mrf.mxu0  ;;  %v422_v56 = vpop.f32.mrf.mxu3 }
  0xc1   : > { %v400_v41 = vadd.f32 %v2554_v31, %v399_v40  ;;  %v423_v60 = vadd.f32 %v2554_v31, %v422_v56  ;;  %v1965_v40 = vor.u32 %v2087_v35, %v1964_v34  ;;  %v1913_v56 = vor.u32 %v2068_v48, %v1910_v49  ;;  %v1804_v35 = vld [vmem:[%s3141_s5 + $0x40] sm:$0xf]  ;;  %v1780_v49 = vld [vmem:[%s3141_s5 + $0x8] sm:$0xf] }
  0xc2   : > { %v2039_v48 = vld [vmem:[%s3141_s5 + $0x1c] sm:$0xf0] }
  0xc3   : > { %v435_v44 = vmax.f32 %v400_v41, 0.0  ;;  %v444_v9 = vmax.f32 %v423_v60, 0.0  ;;  %v1942_v41 = vld [vmem:[%s3141_s5 + $0x168] sm:$0xf0]  ;;  %975 = vmatpush.bf16.msrb.mxu2 %v1965_v40  ;;  %v1900_v60 = vld [vmem:[%s3141_s5 + $0x100] sm:$0xf] }
  0xc4   : > { %v1901_v2 = vor.u32 %v2071_v61, %v1900_v60  ;;  %v2044_v40 = vld [vmem:[%s3141_s5 + $0x4c] sm:$0xf]  ;;  %v2012_v60 = vld [vmem:[%s3141_s5 + $0x1d0] sm:$0xf] }
  0xc5   : > { %v449_v45 = vpack.c.bf16 %v435_v44, %v434_v43  ;;  %v1945_v43 = vor.u32 %v2076_v36, %v1942_v41  ;;  %v1932_v44 = vld [vmem:[%s3141_s5 + $0x140] sm:$0xf]  ;;  %v1814_v41 = vld [vmem:[%s3141_s5 + $0x68] sm:$0xf0]  ;;  %v2097_v61 = vld [vmem:[%s3141_s5 + $0x1ec] sm:$0xf0] }
  0xc6   : > { %v2047_v36 = vld [vmem:[%s3141_s5 + $0x5c] sm:$0xf0] }
  0xc7   : > { %1763 = vmatmul.msk.bf16.gmra.mxu1 %vm492_vm2, %v449_v45  ;;  %v2079_v45 = vld [vmem:[%s3141_s5 + $0x15c] sm:$0xf0] }
  0xc8   : > { %v402_v47 = vpop.f32.mrf.mxu0  ;;  %v424_v10 = vpop.f32.mrf.mxu3  ;;  %1123 = vmatpush.bf16.msrb.mxu1 %v1945_v43  ;;  %v1817_v43 = vor.u32 %v2044_v40, %v1814_v41  ;;  %v1956_v41 = vld [vmem:[%s3141_s5 + $0x158] sm:$0xf] }
  0xc9   : > { %v403_v52 = vadd.f32 %v2554_v31, %v402_v47  ;;  %v425_v15 = vadd.f32 %v2554_v31, %v424_v10  ;;  %v1909_v47 = vor.u32 %v2072_v29, %v1908_v28  ;;  %v1846_v28 = vld [vmem:[%s3141_s5 + $0xa8] sm:$0xf0]  ;;  %v2043_v29 = vld [vmem:[%s3141_s5 + $0x44] sm:$0xf] }
  0xca   : > { %v1849_v33 = vor.u32 %v2052_v27, %v1846_v28 }
  0xcb   : > { %v436_v57 = vmax.f32 %v403_v52, 0.0  ;;  %v445_v23 = vmax.f32 %v425_v15, 0.0  ;;  %v1905_v52 = vor.u32 %v2067_v38, %v1902_v39  ;;  %1075 = vmatpush.bf16.msrb.mxu0 %v1909_v47  ;;  %v1805_v38 = vor.u32 %v2047_v36, %v1804_v35  ;;  %v2048_v39 = vld [vmem:[%s3141_s5 + $0x64] sm:$0xf0]  ;;  %v1918_v36 = vld [vmem:[%s3141_s5 + $0x130] sm:$0xf0] }
  0xcc   : > { %1124 = vmatpush.bf16.msrb.mxu1 %v1913_v56  ;;  %v2093_v56 = vld [vmem:[%s3141_s5 + $0x1d4] sm:$0xf] }
  0xcd   : > { %v454_v32 = vpack.c.bf16 %v445_v23, %v444_v9  ;;  %1026 = vmatpush.bf16.msrb.mxu3 %v1905_v52  ;;  %v2055_v23 = vld [vmem:[%s3141_s5 + $0x9c] sm:$0xf0] }
  0xce   : > { %v1837_v25 = vor.u32 %v2055_v23, %v1836_v22  ;;  %v2090_v22 = vld [vmem:[%s3141_s5 + $0x1b4] sm:$0xf0] }
  0xcf   : > { %1768 = vmatmul.msk.bf16.gmra.mxu2 %vm492_vm2, %v454_v32  ;;  %v1845_v32 = vor.u32 %v2056_v26, %v1844_v24 }
  0xd0   : > { %v404_v54 = vpop.f32.mrf.mxu0  ;;  %v427_v46 = vpop.f32.mrf.mxu3  ;;  %1125 = vmatpush.bf16.msrb.mxu1 %v1881_v21  ;;  %v1988_v21 = vld [vmem:[%s3141_s5 + $0x198] sm:$0xf] }
  0xd1   : > { %v405_v55 = vadd.f32 %v2554_v31, %v404_v54  ;;  %v1870_v54 = vld [vmem:[%s3141_s5 + $0xe0] sm:$0xf0]  ;;  %v428_v63 = vadd.f32 %v2554_v31, %v427_v46  ;;  %v1772_v46 = vld [vmem:[%s3141_s5] sm:$0xf]  ;;  %v1989_v23 = vor.u32 %v2090_v22, %v1988_v21 }
  0xd3   : > { %v437_v58 = vmax.f32 %v405_v55, 0.0  ;;  %v1933_v55 = vor.u32 %v2079_v45, %v1932_v44  ;;  %v446_v6 = vmax.f32 %v428_v63, 0.0  ;;  %v2035_v44 = vld [vmem:[%s3141_s5 + $0x4] sm:$0xf]  ;;  %v2013_v63 = vor.u32 %v2097_v61, %v2012_v60  ;;  %v1924_v60 = vld [vmem:[%s3141_s5 + $0x118] sm:$0xf] }
  0xd4   : > { %1126 = vmatpush.bf16.msrb.mxu1 %v1849_v33  ;;  %v1774_v45 = vld [vmem:[%s3141_s5 + $0x20] sm:$0xf0]  ;;  %v2081_v33 = vld [vmem:[%s3141_s5 + $0x16c] sm:$0xf0]  ;;  %v2074_v61 = vld [vmem:[%s3141_s5 + $0x134] sm:$0xf0] }
  0xd5   : > { %v450_v59 = vpack.c.bf16 %v437_v58, %v436_v57  ;;  %v1876_v57 = vld [vmem:[%s3141_s5 + $0xc8] sm:$0xf]  ;;  %976 = vmatpush.bf16.msrb.mxu2 %v1933_v55  ;;  %v1777_v47 = vor.u32 %v2035_v44, %v1774_v45 }
  0xd6   : > { %v2064_v58 = vld [vmem:[%s3141_s5 + $0xe4] sm:$0xf0] }
  0xd7   : > { %1764 = vmatmul.msk.bf16.gmra.mxu1 %vm492_vm2, %v450_v59  ;;  %v1877_v62 = vor.u32 %v2064_v58, %v1876_v57  ;;  %v2014_v57 = vld [vmem:[%s3141_s5 + $0x1f0] sm:$0xf0] }
  0xd8   : > { %v407_v0 = vpop.f32.mrf.mxu0  ;;  %v429_v5 = vpop.f32.mrf.mxu3  ;;  %1127 = vmatpush.bf16.msrb.mxu1 %v1817_v43  ;;  %v2017_v58 = vor.u32 %v2093_v56, %v2014_v57  ;;  %v2078_v56 = vld [vmem:[%s3141_s5 + $0x15c] sm:$0xf] }
  0xd9   : > { %v408_v30 = vadd.f32 %v2554_v31, %v407_v0  ;;  %v1873_v0 = vor.u32 %v2059_v53, %v1870_v54  ;;  %1076 = vmatpush.bf16.msrb.mxu0 %v1877_v62  ;;  %v430_v7 = vadd.f32 %v2554_v31, %v429_v5  ;;  %977 = vmatpush.bf16.msrb.mxu2 %v1901_v2  ;;  %v2036_v53 = vld [vmem:[%s3141_s5 + $0xc] sm:$0xf]  ;;  %v2085_v62 = vld [vmem:[%s3141_s5 + $0x194] sm:$0xf]  ;;  %v2790_v2 = vld [vmem:[#allocation5] ss:$0 sm:$0xff] }
  0xda   : > { %v1782_v54 = vld [vmem:[%s3141_s5 + $0x28] sm:$0xf0]  ;;  %v2021_v5 = vor.u32 %v2098_v4, %v2020_v3  ;;  %v1958_v57 = vld [vmem:[%s3141_s5 + $0x178] sm:$0xf0] }
  0xdb   : > { %v438_v50 = vmax.f32 %v408_v30, 0.0  ;;  %1027 = vmatpush.bf16.msrb.mxu3 %v1873_v0  ;;  %v447_v9 = vmax.f32 %v430_v7, 0.0  ;;  %v1806_v30 = vld [vmem:[%s3141_s5 + $0x60] sm:$0xf0]  ;;  %v1785_v55 = vor.u32 %v2036_v53, %v1782_v54  ;;  %v1982_v0 = vld [vmem:[%s3141_s5 + $0x1b0] sm:$0xf0] }
  0xdc   : > { %v1809_v34 = vor.u32 %v2043_v29, %v1806_v30  ;;  %v2061_v53 = vld [vmem:[%s3141_s5 + $0xd4] sm:$0xf] }
  0xdd   : > { %v455_v11 = vpack.c.bf16 %v447_v9, %v446_v6  ;;  %1077 = vmatpush.bf16.msrb.mxu0 %v1845_v32  ;;  %1128 = vmatpush.bf16.msrb.mxu1 %v1785_v55  ;;  %v1948_v32 = vld [vmem:[%s3141_s5 + $0x150] sm:$0xf]  ;;  %v1886_v55 = vld [vmem:[%s3141_s5 + $0xf0] sm:$0xf0] }
  0xde   : > { %v1949_v35 = vor.u32 %v2081_v33, %v1948_v32  ;;  %v2045_v32 = vld [vmem:[%s3141_s5 + $0x54] sm:$0xf] }
  0xdf   : > { %1028 = vmatpush.bf16.msrb.mxu3 %v1841_v8  ;;  %1769 = vmatmul.msk.bf16.gmra.mxu2 %vm492_vm2, %v455_v11 }
  0xe0   : > { %v409_v37 = vpop.f32.mrf.mxu0 }
  0xe1   : > { %v410_v42 = vadd.f32 %v2554_v31, %v409_v37  ;;  %v1812_v37 = vld [vmem:[%s3141_s5 + $0x48] sm:$0xf] }
  0xe3   : > { %v439_v51 = vmax.f32 %v410_v42, 0.0  ;;  %1029 = vmatpush.bf16.msrb.mxu3 %v1809_v34  ;;  %v1813_v42 = vor.u32 %v2048_v39, %v1812_v37  ;;  %v2069_v34 = vld [vmem:[%s3141_s5 + $0x114] sm:$0xf]  ;;  %v1990_v39 = vld [vmem:[%s3141_s5 + $0x1b8] sm:$0xf0] }
  0xe4   : > { %v1921_v37 = vor.u32 %v2069_v34, %v1918_v36  ;;  %v1822_v34 = vld [vmem:[%s3141_s5 + $0x70] sm:$0xf0]  ;;  %v1894_v36 = vld [vmem:[%s3141_s5 + $0xf8] sm:$0xf0] }
  0xe5   : > { %v451_v59 = vpack.c.bf16 %v439_v51, %v438_v50  ;;  %1078 = vmatpush.bf16.msrb.mxu0 %v1813_v42  ;;  %v2040_v50 = vld [vmem:[%s3141_s5 + $0x24] sm:$0xf0]  ;;  %v1773_v51 = vor.u32 %v2039_v48, %v1772_v46  ;;  %v2082_v42 = vld [vmem:[%s3141_s5 + $0x174] sm:$0xf0] }
  0xe6   : > { %v1781_v52 = vor.u32 %v2040_v50, %v1780_v49  ;;  %v1957_v43 = vor.u32 %v2082_v42, %v1956_v41  ;;  %v2058_v41 = vld [vmem:[%s3141_s5 + $0xb4] sm:$0xf0] }
  0xe7   : > { %1765 = vmatmul.msk.bf16.gmra.mxu1 %vm492_vm2, %v451_v59  ;;  %1030 = vmatpush.bf16.msrb.mxu3 %v1777_v47 }
  0xe8   : > { %v412_v1 = vpop.f32.mrf.mxu0 }
  0xe9   : > { %v413_v10 = vadd.f32 %v2554_v31, %v412_v1  ;;  %1079 = vmatpush.bf16.msrb.mxu0 %v1781_v52  ;;  %v1985_v1 = vor.u32 %v2085_v62, %v1982_v0  ;;  %v2073_v52 = vld [vmem:[%s3141_s5 + $0x12c] sm:$0xf0]  ;;  %v1925_v62 = vor.u32 %v2074_v61, %v1924_v60  ;;  %v1828_v61 = vld [vmem:[%s3141_s5 + $0x58] sm:$0xf] }
  0xeb   : > { %v440_v14 = vmax.f32 %v413_v10, 0.0  ;;  %1219 = vmatpush.bf16.msra.mxu3 %v2017_v58  ;;  %v1889_v58 = vor.u32 %v2061_v53, %v1886_v55  ;;  %v2037_v53 = vld [vmem:[%s3141_s5 + $0x14] sm:$0xf] }
  0xec   : > { %v1790_v55 = vld [vmem:[%s3141_s5 + $0x30] sm:$0xf0] }
  0xed   : > { %1268 = vmatpush.bf16.msra.mxu0 %v2021_v5 }
  0xef   : > { %1220 = vmatpush.bf16.msra.mxu3 %v1985_v1 }
  0xf0   : > { %v414_v12 = vpop.f32.mrf.mxu0 }
  0xf1   : > { %v415_v13 = vadd.f32 %v2554_v31, %v414_v12  ;;  %v1869_v31 = vor.u32 %v2063_v18, %v1868_v17  ;;  %v1950_v17 = vld [vmem:[%s3141_s5 + $0x170] sm:$0xf0]  ;;  %1269 = vmatpush.bf16.msra.mxu0 %v1989_v23 }
  0xf3   : > { %v441_v15 = vmax.f32 %v415_v13, 0.0  ;;  %978 = vmatpush.bf16.msrb.mxu2 %v1869_v31  ;;  %v1980_v13 = vld [vmem:[%s3141_s5 + $0x190] sm:$0xf]  ;;  %v2022_v31 = vld [vmem:[%s3141_s5 + $0x1f8] sm:$0xf0] }
  0xf4   : > { %v2824_v20 = vor.u32 %v2094_v19, %v2022_v31  ;;  %v2066_v19 = vld [vmem:[%s3141_s5 + $0xf4] sm:$0xf0] }
  0xf5   : > { %v452_v16 = vpack.c.bf16 %v441_v15, %v440_v14  ;;  %v2089_v14 = vld [vmem:[%s3141_s5 + $0x1ac] sm:$0xf0]  ;;  %v2077_v15 = vld [vmem:[%s3141_s5 + $0x154] sm:$0xf]  ;;  %1270 = vmatpush.bf16.msra.mxu0 %v1957_v43 }
  0xf6   : > { %v1953_v18 = vor.u32 %v2077_v15, %v1950_v17  ;;  %1317 = vmatpush.bf16.msra.mxu1 %v2824_v20  ;;  %v1926_v15 = vld [vmem:[%s3141_s5 + $0x138] sm:$0xf0] }
  0xf7   : > { %1766 = vmatmul.msk.bf16.gmra.mxu1 %vm492_vm2, %v452_v16  ;;  %979 = vmatpush.bf16.msrb.mxu2 %v1837_v25  ;;  %v1981_v16 = vor.u32 %v2089_v14, %v1980_v13  ;;  %v1854_v13 = vld [vmem:[%s3141_s5 + $0xb0] sm:$0xf0]  ;;  %v2070_v14 = vld [vmem:[%s3141_s5 + $0x11c] sm:$0xf] }
  0xf8   : > { %1221 = vmatpush.bf16.msra.mxu3 %v1953_v18  ;;  %v2929_v17 = vor.u32 %v2070_v14, %v1926_v15  ;;  %v1892_v18 = vld [vmem:[%s3141_s5 + $0xd8] sm:$0xf]  ;;  %v1798_v15 = vld [vmem:[%s3141_s5 + $0x38] sm:$0xf0] }
  0xf9   : > { %1271 = vmatpush.bf16.msra.mxu0 %v1925_v62  ;;  %v1893_v31 = vor.u32 %v2066_v19, %v1892_v18  ;;  %v2050_v62 = vld [vmem:[%s3141_s5 + $0x74] sm:$0xf0] }
  0xfb   : > { %980 = vmatpush.bf16.msrb.mxu2 %v1805_v38  ;;  %v2086_v38 = vld [vmem:[%s3141_s5 + $0x19c] sm:$0xf] }
  0xfc   : > { %1222 = vmatpush.bf16.msra.mxu3 %v1921_v37  ;;  %v2859_v40 = vor.u32 %v2086_v38, %v1990_v39  ;;  %v1825_v37 = vor.u32 %v2045_v32, %v1822_v34  ;;  %v1860_v39 = vld [vmem:[%s3141_s5 + $0x98] sm:$0xf] }
  0xfd   : > { %1272 = vmatpush.bf16.msra.mxu0 %v1893_v31  ;;  %v1861_v42 = vor.u32 %v2058_v41, %v1860_v39 }
  0xfe   : > { %1318 = vmatpush.bf16.msra.mxu1 %v2859_v40 }
  0xff   : > { %981 = vmatpush.bf16.msrb.mxu2 %v1773_v51  ;;  %v1916_v51 = vld [vmem:[%s3141_s5 + $0x110] sm:$0xf] }
 0x100   : > { %v1917_v54 = vor.u32 %v2073_v52, %v1916_v51  ;;  %1223 = vmatpush.bf16.msra.mxu3 %v1889_v58  ;;  %v1820_v51 = vld [vmem:[%s3141_s5 + $0x50] sm:$0xf]  ;;  %v1793_v58 = vor.u32 %v2037_v53, %v1790_v55 }
 0x101   : > { %1273 = vmatpush.bf16.msra.mxu0 %v1861_v42  ;;  %v2049_v52 = vld [vmem:[%s3141_s5 + $0x6c] sm:$0xf0] }
 0x103   : > { %1170 = vmatpush.bf16.msra.mxu2 %v2013_v63 }
 0x107   : > { %1171 = vmatpush.bf16.msra.mxu2 %v1981_v16 }
 0x10b   : > { %1172 = vmatpush.bf16.msra.mxu2 %v1949_v35  ;;  %v2062_v35 = vld [vmem:[%s3141_s5 + $0xdc] sm:$0xf] }
 0x10c   : > { %v2964_v38 = vor.u32 %v2062_v35, %v1894_v36 }
 0x10f   : > { %1173 = vmatpush.bf16.msra.mxu2 %v1917_v54  ;;  %v1821_v54 = vor.u32 %v2049_v52, %v1820_v51 }
 0x134   : > { %v526_v59 = vpop.f32.mrf.mxu1 }
 0x135   : > { %v527_v6 = vadd.f32 %v2790_v2, %v526_v59  ;;  %v2894_v59 = vor.u32 %v2078_v56, %v1958_v57  ;;  %v2054_v56 = vld [vmem:[%s3141_s5 + $0x9c] sm:$0xf] }
 0x136   : > { %v1862_v57 = vld [vmem:[%s3141_s5 + $0xb8] sm:$0xf0] }
 0x137   : > { %v566_v9 = vmax.f32 %v527_v6, 0.0  ;;  %1319 = vmatpush.bf16.msra.mxu1 %v2894_v59  ;;  %v1865_v60 = vor.u32 %v2054_v56, %v1862_v57 }
 0x13b   : > { %1320 = vmatpush.bf16.msra.mxu1 %v2929_v17 }
 0x13c   : > { %v528_v7 = vpop.f32.mrf.mxu1 }
 0x13d   : > { %v529_v8 = vadd.f32 %v2790_v2, %v528_v7 }
 0x13f   : > { %v567_v10 = vmax.f32 %v529_v8, 0.0  ;;  %v1884_v8 = vld [vmem:[%s3141_s5 + $0xd0] sm:$0xf]  ;;  %1321 = vmatpush.bf16.msra.mxu1 %v2964_v38 }
 0x141   : > { %v2800_v11 = vpack.c.bf16 %v567_v10, %v566_v9  ;;  %v2065_v9 = vld [vmem:[%s3141_s5 + $0xec] sm:$0xf0]  ;;  %v2053_v10 = vld [vmem:[%s3141_s5 + $0x94] sm:$0xf] }
 0x142   : > { %v551_v7 = vpop.f32.mrf.mxu2  ;;  %v1857_v16 = vor.u32 %v2053_v10, %v1854_v13  ;;  %v1788_v10 = vld [vmem:[%s3141_s5 + $0x10] sm:$0xf]  ;;  %v1796_v13 = vld [vmem:[%s3141_s5 + $0x18] sm:$0xf] }
 0x143   : > { %982 = vmatmul.bf16.vlgmr.msrb.gmra.mxu2 %v2800_v11  ;;  %1031 = vmatmul.bf16.vlgmr.msrb.gmra.mxu3 %v2800_v11 }
 0x144   : > { %1080 = vmatmul.bf16.vlgmr.msrb.gmra.mxu0 %v2800_v11  ;;  %1129 = vmatmul.bf16.vlgmr.msrb.gmra.mxu1 %v2800_v11  ;;  %v531_v12 = vpop.f32.mrf.mxu1 }
 0x145   : > { %v532_v24 = vadd.f32 %v2790_v2, %v531_v12  ;;  %v1885_v12 = vor.u32 %v2065_v9, %v1884_v8  ;;  %1224 = vmatpush.bf16.msra.mxu3 %v1857_v16  ;;  %1322 = vmatpush.bf16.msra.mxu1 %v1865_v60 }
 0x147   : > { %v568_v27 = vmax.f32 %v532_v24, 0.0  ;;  %1174 = vmatpush.bf16.msra.mxu2 %v1885_v12  ;;  %v2041_v12 = vld [vmem:[%s3141_s5 + $0x2c] sm:$0xf0] }
 0x148   : > { %v1789_v14 = vor.u32 %v2041_v12, %v1788_v10 }
 0x149   : > { %1225 = vmatpush.bf16.msra.mxu3 %v1825_v37 }
 0x14a   : > { %v553_v24 = vpop.f32.mrf.mxu2 }
 0x14c   : > { %v533_v25 = vpop.f32.mrf.mxu1 }
 0x14d   : > { %v534_v26 = vadd.f32 %v2790_v2, %v533_v25  ;;  %1226 = vmatpush.bf16.msra.mxu3 %v1793_v58 }
 0x14f   : > { %v569_v28 = vmax.f32 %v534_v26, 0.0 }
 0x151   : > { %v2835_v29 = vpack.c.bf16 %v569_v28, %v568_v27  ;;  %v1852_v28 = vld [vmem:[%s3141_s5 + $0x90] sm:$0xf]  ;;  %2104 = vmatpush.bf16.msrb.mxu3 %v2824_v20  ;;  %v2042_v20 = vld [vmem:[%s3141_s5 + $0x34] sm:$0xf0] }
 0x152   : > { %v556_v43 = vpop.f32.mrf.mxu2  ;;  %v1797_v16 = vor.u32 %v2042_v20, %v1796_v13 }
 0x153   : > { %987 = vmatmul.bf16.gmra.mxu2 %v2835_v29  ;;  %1036 = vmatmul.bf16.gmra.mxu3 %v2835_v29 }
 0x154   : > { %1085 = vmatmul.bf16.gmra.mxu0 %v2835_v29  ;;  %1134 = vmatmul.bf16.gmra.mxu1 %v2835_v29  ;;  %v536_v30 = vpop.f32.mrf.mxu1 }
 0x155   : > { %v537_v44 = vadd.f32 %v2790_v2, %v536_v30  ;;  %v2057_v30 = vld [vmem:[%s3141_s5 + $0xac] sm:$0xf0]  ;;  %2105 = vmatpush.bf16.msrb.mxu3 %v2859_v40  ;;  %v2038_v40 = vld [vmem:[%s3141_s5 + $0x1c] sm:$0xf] }
 0x156   : > { %v1853_v33 = vor.u32 %v2057_v30, %v1852_v28  ;;  %v1801_v18 = vor.u32 %v2038_v40, %v1798_v15 }
 0x157   : > { %v570_v47 = vmax.f32 %v537_v44, 0.0  ;;  %v552_v44 = vadd.f32 %v2790_v2, %v551_v7 }
 0x158   : > { %1175 = vmatpush.bf16.msra.mxu2 %v1853_v33 }
 0x159   : > { %2106 = vmatpush.bf16.msrb.mxu3 %v2894_v59 }
 0x15c   : > { %v538_v45 = vpop.f32.mrf.mxu1  ;;  %1176 = vmatpush.bf16.msra.mxu2 %v1821_v54 }
 0x15d   : > { %v539_v46 = vadd.f32 %v2790_v2, %v538_v45  ;;  %v554_v45 = vadd.f32 %v2790_v2, %v553_v24  ;;  %2107 = vmatpush.bf16.msrb.mxu3 %v2929_v17 }
 0x15f   : > { %v571_v48 = vmax.f32 %v539_v46, 0.0  ;;  %v576_v46 = vmax.f32 %v552_v44, 0.0 }
 0x160   : > { %1177 = vmatpush.bf16.msra.mxu2 %v1789_v14 }
 0x161   : > { %v2870_v49 = vpack.c.bf16 %v571_v48, %v570_v47  ;;  %v577_v47 = vmax.f32 %v554_v45, 0.0  ;;  %2108 = vmatpush.bf16.msrb.mxu3 %v2964_v38 }
 0x163   : > { %992 = vmatmul.bf16.gmra.mxu2 %v2870_v49  ;;  %1041 = vmatmul.bf16.gmra.mxu3 %v2870_v49  ;;  %v2975_v48 = vpack.c.bf16 %v577_v47, %v576_v46 }
 0x164   : > { %1090 = vmatmul.bf16.gmra.mxu0 %v2870_v49  ;;  %1139 = vmatmul.bf16.gmra.mxu1 %v2870_v49  ;;  %v541_v50 = vpop.f32.mrf.mxu1 }
 0x165   : > { %v542_v63 = vadd.f32 %v2790_v2, %v541_v50  ;;  %v558_v50 = vpop.f32.mrf.mxu2  ;;  %2109 = vmatpush.bf16.msrb.mxu3 %v1865_v60 }
 0x167   : > { %v572_v3 = vmax.f32 %v542_v63, 0.0  ;;  %v2046_v63 = vld [vmem:[%s3141_s5 + $0x5c] sm:$0xf] }
 0x16c   : > { %v543_v0 = vpop.f32.mrf.mxu1 }
 0x16d   : > { %v544_v1 = vadd.f32 %v2790_v2, %v543_v0  ;;  %v1829_v0 = vor.u32 %v2050_v62, %v1828_v61  ;;  %v561_v7 = vpop.f32.mrf.mxu2 }
 0x16f   : > { %v573_v4 = vmax.f32 %v544_v1, 0.0  ;;  %v1830_v1 = vld [vmem:[%s3141_s5 + $0x78] sm:$0xf0]  ;;  %1274 = vmatpush.bf16.msra.mxu0 %v1829_v0 }
 0x171   : > { %v2905_v5 = vpack.c.bf16 %v573_v4, %v572_v3  ;;  %v1833_v3 = vor.u32 %v2046_v63, %v1830_v1  ;;  %v557_v4 = vadd.f32 %v2790_v2, %v556_v43 }
 0x173   : > { %997 = vmatmul.bf16.gmra.mxu2 %v2905_v5  ;;  %1046 = vmatmul.bf16.gmra.mxu3 %v2905_v5  ;;  %v578_v8 = vmax.f32 %v557_v4, 0.0 }
 0x174   : > { %1095 = vmatmul.bf16.gmra.mxu0 %v2905_v5  ;;  %1144 = vmatmul.bf16.gmra.mxu1 %v2905_v5  ;;  %v546_v6 = vpop.f32.mrf.mxu1 }
 0x175   : > { %v547_v21 = vadd.f32 %v2790_v2, %v546_v6  ;;  %v559_v6 = vadd.f32 %v2790_v2, %v558_v50  ;;  %1323 = vmatpush.bf16.msra.mxu1 %v1833_v3  ;;  %1275 = vmatpush.bf16.msra.mxu0 %v1797_v16  ;;  %v563_v31 = vpop.f32.mrf.mxu2 }
 0x176   : > { %2110 = vmatpush.bf16.msrb.mxu3 %v1833_v3 }
 0x177   : > { %v574_v25 = vmax.f32 %v547_v21, 0.0  ;;  %v579_v9 = vmax.f32 %v559_v6, 0.0  ;;  %v562_v21 = vadd.f32 %v2790_v2, %v561_v7 }
 0x179   : > { %v3033_v19 = vpack.c.bf16 %v579_v9, %v578_v8  ;;  %1324 = vmatpush.bf16.msra.mxu1 %v1801_v18  ;;  %v580_v59 = vmax.f32 %v562_v21, 0.0 }
 0x17a   : > { %2111 = vmatpush.bf16.msrb.mxu3 %v1801_v18 }
 0x17c   : > { %v548_v22 = vpop.f32.mrf.mxu1 }
 0x17d   : > { %v549_v23 = vadd.f32 %v2790_v2, %v548_v22  ;;  %v564_v22 = vadd.f32 %v2790_v2, %v563_v31 }
 0x17f   : > { %v575_v26 = vmax.f32 %v549_v23, 0.0  ;;  %v581_v23 = vmax.f32 %v564_v22, 0.0 }
 0x181   : > { %v2940_v27 = vpack.c.bf16 %v575_v26, %v574_v25  ;;  %v3044_v24 = vpack.c.bf16 %v581_v23, %v580_v59 }
 0x183   : > { %1002 = vmatmul.bf16.gmra.mxu2 %v2940_v27  ;;  %1051 = vmatmul.bf16.gmra.mxu3 %v2940_v27 }
 0x184   : > { %1100 = vmatmul.bf16.gmra.mxu0 %v2940_v27  ;;  %1149 = vmatmul.bf16.gmra.mxu1 %v2940_v27 }
 0x193   : > { %1007 = vmatmul.bf16.gmra.mxu2 %v2975_v48  ;;  %1056 = vmatmul.bf16.gmra.mxu3 %v2975_v48 }
 0x194   : > { %1105 = vmatmul.bf16.gmra.mxu0 %v2975_v48  ;;  %1154 = vmatmul.bf16.gmra.mxu1 %v2975_v48 }
 0x1a3   : > { %1012 = vmatmul.bf16.gmra.mxu2 %v3033_v19  ;;  %1061 = vmatmul.bf16.gmra.mxu3 %v3033_v19 }
 0x1a4   : > { %1110 = vmatmul.bf16.gmra.mxu0 %v3033_v19  ;;  %1159 = vmatmul.bf16.gmra.mxu1 %v3033_v19 }
 0x1b3   : > { %1017 = vmatmul.bf16.gmra.mxu2 %v3044_v24  ;;  %1066 = vmatmul.bf16.gmra.mxu3 %v3044_v24 }
 0x1b4   : > { %1115 = vmatmul.bf16.gmra.mxu0 %v3044_v24  ;;  %1164 = vmatmul.bf16.gmra.mxu1 %v3044_v24 }
 0x1c1   : > { %v1081_v17 = vpop.f32.mrf.mxu0  ;;  %v1130_v25 = vpop.f32.mrf.mxu1 }
 0x1c3   : > { %1178 = vmatmul.bf16.vlgmr.msra.gmra.mxu2 %v2800_v11  ;;  %1227 = vmatmul.bf16.vlgmr.msra.gmra.mxu3 %v2800_v11 }
 0x1c4   : > { %1276 = vmatmul.bf16.vlgmr.msra.gmra.mxu0 %v2800_v11  ;;  %1325 = vmatmul.bf16.vlgmr.msra.gmra.mxu1 %v2800_v11 }
 0x1c6   : > { %v983_v2 = vpop.f32.mrf.mxu2  ;;  %v1032_v26 = vpop.f32.mrf.mxu3 }
 0x1c9   : > { %v1083_v28 = vpop.f32.mrf.mxu0  ;;  %v1132_v30 = vpop.f32.mrf.mxu1 }
 0x1ca   : > { %v1408_v32 = vmax.f32 %v1081_v17, %v1083_v28  ;;  %v1429_v33 = vmax.f32 %v1130_v25, %v1132_v30 }
 0x1ce   : > { %v985_v34 = vpop.f32.mrf.mxu2  ;;  %v1034_v35 = vpop.f32.mrf.mxu3 }
 0x1cf   : > { %v1366_v36 = vmax.f32 %v983_v2, %v985_v34  ;;  %v1387_v37 = vmax.f32 %v1032_v26, %v1034_v35 }
 0x1d1   : > { %v1086_v38 = vpop.f32.mrf.mxu0  ;;  %v1135_v39 = vpop.f32.mrf.mxu1 }
 0x1d2   : > { %v1409_v41 = vmax.f32 %v1408_v32, %v1086_v38  ;;  %v1430_v42 = vmax.f32 %v1429_v33, %v1135_v39 }
 0x1d3   : > { %1183 = vmatmul.bf16.gmra.mxu2 %v2835_v29  ;;  %1232 = vmatmul.bf16.gmra.mxu3 %v2835_v29 }
 0x1d4   : > { %1281 = vmatmul.bf16.gmra.mxu0 %v2835_v29  ;;  %1330 = vmatmul.bf16.gmra.mxu1 %v2835_v29 }
 0x1d6   : > { %v988_v11 = vpop.f32.mrf.mxu2  ;;  %v1037_v43 = vpop.f32.mrf.mxu3 }
 0x1d7   : > { %v1367_v44 = vmax.f32 %v1366_v36, %v988_v11  ;;  %v1388_v45 = vmax.f32 %v1387_v37, %v1037_v43 }
 0x1d9   : > { %v1088_v46 = vpop.f32.mrf.mxu0  ;;  %v1137_v47 = vpop.f32.mrf.mxu1 }
 0x1da   : > { %v1410_v50 = vmax.f32 %v1409_v41, %v1088_v46  ;;  %v1431_v51 = vmax.f32 %v1430_v42, %v1137_v47 }
 0x1de   : > { %v990_v52 = vpop.f32.mrf.mxu2  ;;  %v1039_v53 = vpop.f32.mrf.mxu3 }
 0x1df   : > { %v1368_v54 = vmax.f32 %v1367_v44, %v990_v52  ;;  %v1389_v55 = vmax.f32 %v1388_v45, %v1039_v53 }
 0x1e1   : > { %v1091_v56 = vpop.f32.mrf.mxu0  ;;  %v1140_v57 = vpop.f32.mrf.mxu1 }
 0x1e2   : > { %v1411_v58 = vmax.f32 %v1410_v50, %v1091_v56  ;;  %v1432_v60 = vmax.f32 %v1431_v51, %v1140_v57 }
 0x1e3   : > { %1188 = vmatmul.bf16.gmra.mxu2 %v2870_v49  ;;  %1237 = vmatmul.bf16.gmra.mxu3 %v2870_v49 }
 0x1e4   : > { %1286 = vmatmul.bf16.gmra.mxu0 %v2870_v49  ;;  %1335 = vmatmul.bf16.gmra.mxu1 %v2870_v49 }
 0x1e6   : > { %v993_v29 = vpop.f32.mrf.mxu2  ;;  %v1042_v61 = vpop.f32.mrf.mxu3 }
 0x1e7   : > { %v1369_v62 = vmax.f32 %v1368_v54, %v993_v29  ;;  %v1390_v63 = vmax.f32 %v1389_v55, %v1042_v61 }
 0x1e9   : > { %v1093_v0 = vpop.f32.mrf.mxu0  ;;  %v1142_v1 = vpop.f32.mrf.mxu1 }
 0x1ea   : > { %v1412_v3 = vmax.f32 %v1411_v58, %v1093_v0  ;;  %v1433_v4 = vmax.f32 %v1432_v60, %v1142_v1 }
 0x1ee   : > { %v995_v6 = vpop.f32.mrf.mxu2  ;;  %v1044_v7 = vpop.f32.mrf.mxu3 }
 0x1ef   : > { %v1370_v8 = vmax.f32 %v1369_v62, %v995_v6  ;;  %v1391_v9 = vmax.f32 %v1390_v63, %v1044_v7 }
 0x1f1   : > { %v1096_v10 = vpop.f32.mrf.mxu0  ;;  %v1145_v12 = vpop.f32.mrf.mxu1 }
 0x1f2   : > { %v1413_v13 = vmax.f32 %v1412_v3, %v1096_v10  ;;  %v1434_v14 = vmax.f32 %v1433_v4, %v1145_v12 }
 0x1f3   : > { %1193 = vmatmul.bf16.gmra.mxu2 %v2905_v5  ;;  %1242 = vmatmul.bf16.gmra.mxu3 %v2905_v5 }
 0x1f4   : > { %1291 = vmatmul.bf16.gmra.mxu0 %v2905_v5  ;;  %1340 = vmatmul.bf16.gmra.mxu1 %v2905_v5 }
 0x1f6   : > { %v998_v49 = vpop.f32.mrf.mxu2  ;;  %v1047_v20 = vpop.f32.mrf.mxu3 }
 0x1f7   : > { %v1371_v40 = vmax.f32 %v1370_v8, %v998_v49  ;;  %v1392_v15 = vmax.f32 %v1391_v9, %v1047_v20 }
 0x1f9   : > { %v1098_v16 = vpop.f32.mrf.mxu0  ;;  %v1147_v18 = vpop.f32.mrf.mxu1 }
 0x1fa   : > { %v1414_v31 = vmax.f32 %v1413_v13, %v1098_v16  ;;  %v1435_v21 = vmax.f32 %v1434_v14, %v1147_v18 }
 0x1fe   : > { %v1000_v22 = vpop.f32.mrf.mxu2  ;;  %v1049_v59 = vpop.f32.mrf.mxu3 }
 0x1ff   : > { %v1372_v23 = vmax.f32 %v1371_v40, %v1000_v22  ;;  %v1393_v17 = vmax.f32 %v1392_v15, %v1049_v59 }
 0x201   : > { %v1101_v25 = vpop.f32.mrf.mxu0  ;;  %v1150_v2 = vpop.f32.mrf.mxu1 }
 0x202   : > { %v1415_v26 = vmax.f32 %v1414_v31, %v1101_v25  ;;  %v1436_v28 = vmax.f32 %v1435_v21, %v1150_v2 }
 0x203   : > { %1198 = vmatmul.bf16.gmra.mxu2 %v2940_v27  ;;  %1247 = vmatmul.bf16.gmra.mxu3 %v2940_v27 }
 0x204   : > { %1296 = vmatmul.bf16.gmra.mxu0 %v2940_v27  ;;  %1345 = vmatmul.bf16.gmra.mxu1 %v2940_v27 }
 0x206   : > { %v1003_v5 = vpop.f32.mrf.mxu2  ;;  %v1052_v30 = vpop.f32.mrf.mxu3 }
 0x207   : > { %v1373_v32 = vmax.f32 %v1372_v23, %v1003_v5  ;;  %v1394_v33 = vmax.f32 %v1393_v17, %v1052_v30 }
 0x209   : > { %v1103_v34 = vpop.f32.mrf.mxu0  ;;  %v1152_v35 = vpop.f32.mrf.mxu1 }
 0x20a   : > { %v1416_v36 = vmax.f32 %v1415_v26, %v1103_v34  ;;  %v1437_v37 = vmax.f32 %v1436_v28, %v1152_v35 }
 0x20e   : > { %v1005_v38 = vpop.f32.mrf.mxu2  ;;  %v1054_v39 = vpop.f32.mrf.mxu3 }
 0x20f   : > { %v1374_v41 = vmax.f32 %v1373_v32, %v1005_v38  ;;  %v1395_v42 = vmax.f32 %v1394_v33, %v1054_v39 }
 0x211   : > { %v1106_v11 = vpop.f32.mrf.mxu0  ;;  %v1155_v43 = vpop.f32.mrf.mxu1 }
 0x212   : > { %v1417_v44 = vmax.f32 %v1416_v36, %v1106_v11  ;;  %v1438_v45 = vmax.f32 %v1437_v37, %v1155_v43 }
 0x213   : > { %1203 = vmatmul.bf16.gmra.mxu2 %v2975_v48  ;;  %1252 = vmatmul.bf16.gmra.mxu3 %v2975_v48 }
 0x214   : > { %1301 = vmatmul.bf16.gmra.mxu0 %v2975_v48  ;;  %1350 = vmatmul.bf16.gmra.mxu1 %v2975_v48 }
 0x216   : > { %v1008_v27 = vpop.f32.mrf.mxu2  ;;  %v1057_v46 = vpop.f32.mrf.mxu3 }
 0x217   : > { %v1375_v47 = vmax.f32 %v1374_v41, %v1008_v27  ;;  %v1396_v50 = vmax.f32 %v1395_v42, %v1057_v46 }
 0x219   : > { %v1108_v51 = vpop.f32.mrf.mxu0  ;;  %v1157_v52 = vpop.f32.mrf.mxu1 }
 0x21a   : > { %v1418_v53 = vmax.f32 %v1417_v44, %v1108_v51  ;;  %v1439_v54 = vmax.f32 %v1438_v45, %v1157_v52 }
 0x21e   : > { %v1010_v55 = vpop.f32.mrf.mxu2  ;;  %v1059_v56 = vpop.f32.mrf.mxu3 }
 0x21f   : > { %v1376_v57 = vmax.f32 %v1375_v47, %v1010_v55  ;;  %v1397_v58 = vmax.f32 %v1396_v50, %v1059_v56 }
 0x221   : > { %v1111_v60 = vpop.f32.mrf.mxu0  ;;  %v1160_v29 = vpop.f32.mrf.mxu1 }
 0x222   : > { %v1419_v61 = vmax.f32 %v1418_v53, %v1111_v60  ;;  %v1440_v62 = vmax.f32 %v1439_v54, %v1160_v29 }
 0x223   : > { %1208 = vmatmul.bf16.gmra.mxu2 %v3033_v19  ;;  %1257 = vmatmul.bf16.gmra.mxu3 %v3033_v19 }
 0x224   : > { %1306 = vmatmul.bf16.gmra.mxu0 %v3033_v19  ;;  %1355 = vmatmul.bf16.gmra.mxu1 %v3033_v19 }
 0x226   : > { %v1013_v48 = vpop.f32.mrf.mxu2  ;;  %v1062_v63 = vpop.f32.mrf.mxu3 }
 0x227   : > { %v1377_v0 = vmax.f32 %v1376_v57, %v1013_v48  ;;  %v1398_v1 = vmax.f32 %v1397_v58, %v1062_v63 }
 0x229   : > { %v1113_v3 = vpop.f32.mrf.mxu0  ;;  %v1162_v4 = vpop.f32.mrf.mxu1 }
 0x22a   : > { %v1420_v6 = vmax.f32 %v1419_v61, %v1113_v3  ;;  %v1441_v7 = vmax.f32 %v1440_v62, %v1162_v4 }
 0x22e   : > { %v1015_v8 = vpop.f32.mrf.mxu2  ;;  %v1064_v9 = vpop.f32.mrf.mxu3 }
 0x22f   : > { %v1378_v10 = vmax.f32 %v1377_v0, %v1015_v8  ;;  %v1399_v12 = vmax.f32 %v1398_v1, %v1064_v9 }
 0x231   : > { %v1116_v13 = vpop.f32.mrf.mxu0  ;;  %v1165_v14 = vpop.f32.mrf.mxu1 }
 0x232   : > { %v1421_v49 = vmax.f32 %v1420_v6, %v1116_v13  ;;  %v1442_v20 = vmax.f32 %v1441_v7, %v1165_v14 }
 0x233   : > { %1213 = vmatmul.bf16.gmra.mxu2 %v3044_v24  ;;  %1262 = vmatmul.bf16.gmra.mxu3 %v3044_v24 }
 0x234   : > { %1311 = vmatmul.bf16.gmra.mxu0 %v3044_v24 }
 0x236   : > { %v1018_v19 = vpop.f32.mrf.mxu2  ;;  %v1067_v40 = vpop.f32.mrf.mxu3 }
 0x237   : > { %v1379_v15 = vmax.f32 %v1378_v10, %v1018_v19  ;;  %v1400_v16 = vmax.f32 %v1399_v12, %v1067_v40 }
 0x239   : > { %v1118_v18 = vpop.f32.mrf.mxu0  ;;  %v1167_v31 = vpop.f32.mrf.mxu1 }
 0x23a   : > { %v1422_v21 = vmax.f32 %v1421_v49, %v1118_v18  ;;  %v1443_v22 = vmax.f32 %v1442_v20, %v1167_v31 }
 0x23c   : > { %v1423_v59 = vrot.slane %v1422_v21, 4  ;;  %v1444_v23 = vrot.slane %v1443_v22, 4 }
 0x23e   : > { %v1424_v17 = vmax.f32 %v1422_v21, %v1423_v59  ;;  %v1445_v25 = vmax.f32 %v1443_v22, %v1444_v23  ;;  %v1020_v2 = vpop.f32.mrf.mxu2  ;;  %v1069_v26 = vpop.f32.mrf.mxu3 }
 0x23f   : > { %v1380_v28 = vmax.f32 %v1379_v15, %v1020_v2  ;;  %v1401_v5 = vmax.f32 %v1400_v16, %v1069_v26 }
 0x240   : > { %v1425_v30 = vrot.slane %v1424_v17, 2  ;;  %v1446_v32 = vrot.slane %v1445_v25, 2 }
 0x241   : > { %v1381_v33 = vrot.slane %v1380_v28, 4  ;;  %v1402_v34 = vrot.slane %v1401_v5, 4  ;;  %v1277_v35 = vpop.f32.mrf.mxu0  ;;  %v1326_v36 = vpop.f32.mrf.mxu1 }
 0x242   : > { %v1426_v37 = vmax.f32 %v1424_v17, %v1425_v30  ;;  %v1447_v38 = vmax.f32 %v1445_v25, %v1446_v32 }
 0x243   : > { %v1382_v39 = vmax.f32 %v1380_v28, %v1381_v33  ;;  %v1403_v41 = vmax.f32 %v1401_v5, %v1402_v34  ;;  %1360 = vmatmul.bf16.vlgmr.msrb.gmra.mxu3 %v3044_v24 }
 0x244   : > { %v1427_v42 = vrot.slane %v1426_v37, 1  ;;  %v1448_v11 = vrot.slane %v1447_v38, 1 }
 0x245   : > { %v1383_v43 = vrot.slane %v1382_v39, 2  ;;  %v1404_v44 = vrot.slane %v1403_v41, 2 }
 0x246   : > { %v1428_v45 = vmax.f32 %v1426_v37, %v1427_v42  ;;  %v1449_v27 = vmax.f32 %v1447_v38, %v1448_v11  ;;  %v1179_v46 = vpop.f32.mrf.mxu2  ;;  %v1228_v47 = vpop.f32.mrf.mxu3 }
 0x247   : > { %v1384_v50 = vmax.f32 %v1382_v39, %v1383_v43  ;;  %v1405_v51 = vmax.f32 %v1403_v41, %v1404_v44 }
 0x248   : > { %v1547_v52 = vrot.slane %v1428_v45, 6  ;;  %v1548_v53 = vrot.slane %v1449_v27, 5 }
 0x249   : > { %v1385_v54 = vrot.slane %v1384_v50, 1  ;;  %v1406_v55 = vrot.slane %v1405_v51, 1  ;;  %v1279_v56 = vpop.f32.mrf.mxu0  ;;  %v1328_v57 = vpop.f32.mrf.mxu1 }
 0x24a   : > { %v1556_v58 = vsel %vm1555_vm3, %v1547_v52, %v1548_v53  ;;  %v1492_v60 = vmax.f32 %v1277_v35, %v1279_v56  ;;  %v1513_v24 = vmax.f32 %v1326_v36, %v1328_v57 }
 0x24b   : > { %v1407_v29 = vmax.f32 %v1405_v51, %v1406_v55  ;;  %v1386_v61 = vmax.f32 %v1384_v50, %v1385_v54 }
 0x24d   : > { %v1546_v62 = vrot.slane %v1407_v29, 7 }
 0x24e   : > { %v1181_v48 = vpop.f32.mrf.mxu2  ;;  %v1230_v63 = vpop.f32.mrf.mxu3 }
 0x24f   : > { %v1554_v0 = vsel %vm1553_vm4, %v1386_v61, %v1546_v62  ;;  %v1450_v1 = vmax.f32 %v1179_v46, %v1181_v48  ;;  %v1471_v3 = vmax.f32 %v1228_v47, %v1230_v63 }
 0x250   : > { %v3082_v4 = vsel %vm1557_vm5, %v1554_v0, %v1556_v58 }
 0x251   : > { %v1282_v6 = vpop.f32.mrf.mxu0  ;;  %v1331_v7 = vpop.f32.mrf.mxu1 }
 0x252   : > { %v1493_v8 = vmax.f32 %v1492_v60, %v1282_v6  ;;  %v3084_v9 = vmax.f32 %v1513_v24, %v1331_v7 }
 0x256   : > { %v1184_v10 = vpop.f32.mrf.mxu2  ;;  %v1233_v12 = vpop.f32.mrf.mxu3 }
 0x257   : > { %v1451_v13 = vmax.f32 %v1450_v1, %v1184_v10  ;;  %v1472_v14 = vmax.f32 %v1471_v3, %v1233_v12 }
 0x259   : > { %v1284_v49 = vpop.f32.mrf.mxu0  ;;  %v3086_v21 = vpop.f32.mrf.mxu1 }
 0x25a   : > { %v1494_v20 = vmax.f32 %v1493_v8, %v1284_v49 }
 0x25e   : > { %v1186_v19 = vpop.f32.mrf.mxu2  ;;  %v1235_v40 = vpop.f32.mrf.mxu3 }
 0x25f   : > { %v1452_v15 = vmax.f32 %v1451_v13, %v1186_v19  ;;  %v1473_v16 = vmax.f32 %v1472_v14, %v1235_v40 }
 0x261   : > { %v1287_v18 = vpop.f32.mrf.mxu0  ;;  %v1336_v2 = vpop.f32.mrf.mxu1 }
 0x262   : > { %v1495_v31 = vmax.f32 %v1494_v20, %v1287_v18  ;;  %v1515_v18 = vmax.f32 %v3084_v9, %v3086_v21 }
 0x266   : > { %v1189_v22 = vpop.f32.mrf.mxu2  ;;  %v1238_v59 = vpop.f32.mrf.mxu3 }
 0x267   : > { %v1453_v23 = vmax.f32 %v1452_v15, %v1189_v22  ;;  %v1474_v17 = vmax.f32 %v1473_v16, %v1238_v59 }
 0x269   : > { %v1289_v25 = vpop.f32.mrf.mxu0  ;;  %v1338_v34 = vpop.f32.mrf.mxu1 }
 0x26a   : > { %v1496_v62 = vmax.f32 %v1495_v31, %v1289_v25 }
 0x26e   : > { %v1191_v26 = vpop.f32.mrf.mxu2  ;;  %v1240_v28 = vpop.f32.mrf.mxu3 }
 0x26f   : > { %v1475_v5 = vmax.f32 %v1474_v17, %v1240_v28  ;;  %v1454_v61 = vmax.f32 %v1453_v23, %v1191_v26  ;;  %v1516_v23 = vmax.f32 %v1515_v18, %v1336_v2 }
 0x271   : > { %v1292_v30 = vpop.f32.mrf.mxu0  ;;  %v1341_v41 = vpop.f32.mrf.mxu1  ;;  %v1517_v28 = vmax.f32 %v1516_v23, %v1338_v34 }
 0x272   : > { %v1497_v1 = vmax.f32 %v1496_v62, %v1292_v30 }
 0x276   : > { %v1194_v32 = vpop.f32.mrf.mxu2  ;;  %v1243_v33 = vpop.f32.mrf.mxu3 }
 0x277   : > { %v1476_v35 = vmax.f32 %v1475_v5, %v1243_v33  ;;  %v1455_v48 = vmax.f32 %v1454_v61, %v1194_v32  ;;  %v1518_v33 = vmax.f32 %v1517_v28, %v1341_v41 }
 0x279   : > { %v1294_v36 = vpop.f32.mrf.mxu0  ;;  %v1343_v45 = vpop.f32.mrf.mxu1 }
 0x27a   : > { %v1498_v6 = vmax.f32 %v1497_v1, %v1294_v36  ;;  %v1519_v9 = vmax.f32 %v1518_v33, %v1343_v45 }
 0x27e   : > { %v1196_v37 = vpop.f32.mrf.mxu2  ;;  %v1245_v38 = vpop.f32.mrf.mxu3 }
 0x27f   : > { %v1477_v39 = vmax.f32 %v1476_v35, %v1245_v38  ;;  %v1456_v3 = vmax.f32 %v1455_v48, %v1196_v37 }
 0x281   : > { %v1297_v42 = vpop.f32.mrf.mxu0  ;;  %v1346_v50 = vpop.f32.mrf.mxu1 }
 0x282   : > { %v1499_v10 = vmax.f32 %v1498_v6, %v1297_v42  ;;  %v1520_v2 = vmax.f32 %v1519_v9, %v1346_v50 }
 0x286   : > { %v1199_v11 = vpop.f32.mrf.mxu2  ;;  %v1248_v43 = vpop.f32.mrf.mxu3 }
 0x287   : > { %v1457_v7 = vmax.f32 %v1456_v3, %v1199_v11  ;;  %v1478_v8 = vmax.f32 %v1477_v39, %v1248_v43 }
 0x289   : > { %v1299_v44 = vpop.f32.mrf.mxu0  ;;  %v1348_v56 = vpop.f32.mrf.mxu1 }
 0x28a   : > { %v1500_v20 = vmax.f32 %v1499_v10, %v1299_v44  ;;  %v1521_v34 = vmax.f32 %v1520_v2, %v1348_v56 }
 0x28e   : > { %v1201_v27 = vpop.f32.mrf.mxu2  ;;  %v1250_v46 = vpop.f32.mrf.mxu3 }
 0x28f   : > { %v1458_v12 = vmax.f32 %v1457_v7, %v1201_v27  ;;  %v1479_v13 = vmax.f32 %v1478_v8, %v1250_v46 }
 0x291   : > { %v1302_v47 = vpop.f32.mrf.mxu0  ;;  %v1351_v24 = vpop.f32.mrf.mxu1 }
 0x292   : > { %v1501_v31 = vmax.f32 %v1500_v20, %v1302_v47 }
 0x296   : > { %v1204_v51 = vpop.f32.mrf.mxu2  ;;  %v1253_v52 = vpop.f32.mrf.mxu3 }
 0x297   : > { %v1459_v19 = vmax.f32 %v1458_v12, %v1204_v51  ;;  %v1480_v40 = vmax.f32 %v1479_v13, %v1253_v52 }
 0x299   : > { %v1304_v53 = vpop.f32.mrf.mxu0  ;;  %v1353_v14 = vpop.f32.mrf.mxu1 }
 0x29a   : > { %v1502_v17 = vmax.f32 %v1501_v31, %v1304_v53  ;;  %v1522_v53 = vmax.f32 %v1521_v34, %v1351_v24 }
 0x29e   : > { %v1206_v54 = vpop.f32.mrf.mxu2  ;;  %v1255_v55 = vpop.f32.mrf.mxu3 }
 0x29f   : > { %v1460_v22 = vmax.f32 %v1459_v19, %v1206_v54  ;;  %v1481_v59 = vmax.f32 %v1480_v40, %v1255_v55 }
 0x2a1   : > { %v1307_v57 = vpop.f32.mrf.mxu0  ;;  %v1356_v35 = vpop.f32.mrf.mxu1 }
 0x2a2   : > { %v1503_v5 = vmax.f32 %v1502_v17, %v1307_v57 }
 0x2a6   : > { %v1209_v58 = vpop.f32.mrf.mxu2  ;;  %v1258_v60 = vpop.f32.mrf.mxu3 }
 0x2a7   : > { %v1461_v25 = vmax.f32 %v1460_v22, %v1209_v58  ;;  %v1482_v26 = vmax.f32 %v1481_v59, %v1258_v60  ;;  %v1523_v58 = vmax.f32 %v1522_v53, %v1353_v14 }
 0x2a9   : > { %v1309_v29 = vpop.f32.mrf.mxu0  ;;  %v1358_v61 = vpop.f32.mrf.mxu1  ;;  %v1524_v45 = vmax.f32 %v1523_v58, %v1356_v35 }
 0x2aa   : > { %v1504_v36 = vmax.f32 %v1503_v5, %v1309_v29 }
 0x2ae   : > { %v1211_v63 = vpop.f32.mrf.mxu2  ;;  %v1260_v0 = vpop.f32.mrf.mxu3 }
 0x2af   : > { %v1462_v30 = vmax.f32 %v1461_v25, %v1211_v63  ;;  %v1483_v32 = vmax.f32 %v1482_v26, %v1260_v0  ;;  %v1525_v63 = vmax.f32 %v1524_v45, %v1358_v61 }
 0x2b1   : > { %v1312_v49 = vpop.f32.mrf.mxu0 }
 0x2b2   : > { %v1505_v21 = vmax.f32 %v1504_v36, %v1312_v49 }
 0x2b6   : > { %v1214_v15 = vpop.f32.mrf.mxu2  ;;  %v1263_v16 = vpop.f32.mrf.mxu3 }
 0x2b7   : > { %v1463_v37 = vmax.f32 %v1462_v30, %v1214_v15  ;;  %v1484_v38 = vmax.f32 %v1483_v32, %v1263_v16 }
 0x2b9   : > { %v1314_v39 = vpop.f32.mrf.mxu0 }
 0x2ba   : > { %v1506_v27 = vmax.f32 %v1505_v21, %v1314_v39 }
 0x2bc   : > { %v1507_v41 = vrot.slane %v1506_v27, 4 }
 0x2be   : > { %v1216_v42 = vpop.f32.mrf.mxu2  ;;  %v1265_v11 = vpop.f32.mrf.mxu3  ;;  %v1508_v62 = vmax.f32 %v1506_v27, %v1507_v41 }
 0x2bf   : > { %v1464_v43 = vmax.f32 %v1463_v37, %v1216_v42  ;;  %v1485_v44 = vmax.f32 %v1484_v38, %v1265_v11 }
 0x2c0   : > { %v1509_v24 = vrot.slane %v1508_v62, 2 }
 0x2c1   : > { %v1465_v46 = vrot.slane %v1464_v43, 4  ;;  %v1486_v47 = vrot.slane %v1485_v44, 4 }
 0x2c2   : > { %v1510_v12 = vmax.f32 %v1508_v62, %v1509_v24 }
 0x2c3   : > { %v1466_v51 = vmax.f32 %v1464_v43, %v1465_v46  ;;  %v1487_v52 = vmax.f32 %v1485_v44, %v1486_v47 }
 0x2c4   : > { %v1511_v49 = vrot.slane %v1510_v12, 1 }
 0x2c5   : > { %v1467_v54 = vrot.slane %v1466_v51, 2  ;;  %v1488_v55 = vrot.slane %v1487_v52, 2 }
 0x2c6   : > { %v1361_v57 = vpop.f32.mrf.mxu3  ;;  %v1512_v40 = vmax.f32 %v1510_v12, %v1511_v49 }
 0x2c7   : > { %v1468_v60 = vmax.f32 %v1466_v51, %v1467_v54  ;;  %v1489_v29 = vmax.f32 %v1487_v52, %v1488_v55  ;;  %v1526_v6 = vmax.f32 %v1525_v63, %v1361_v57 }
 0x2c8   : > { %v1551_v18 = vrot.slane %v1512_v40, 2 }
 0x2c9   : > { %v1469_v48 = vrot.slane %v1468_v60, 1  ;;  %v1490_v50 = vrot.slane %v1489_v29, 1 }
 0x2cb   : > { %v1470_v56 = vmax.f32 %v1468_v60, %v1469_v48  ;;  %v1491_v0 = vmax.f32 %v1489_v29, %v1490_v50 }
 0x2cd   : > { %v1549_v1 = vrot.slane %v1470_v56, 4  ;;  %v1550_v3 = vrot.slane %v1491_v0, 3 }
 0x2ce   : > { %v1363_v7 = vpop.f32.mrf.mxu3 }
 0x2cf   : > { %v1560_v8 = vsel %vm1559_vm6, %v1549_v1, %v1550_v3  ;;  %v1527_v10 = vmax.f32 %v1526_v6, %v1363_v7 }
 0x2d1   : > { %v1528_v13 = vrot.slane %v1527_v10, 4 }
 0x2d3   : > { %v1529_v14 = vmax.f32 %v1527_v10, %v1528_v13 }
 0x2d5   : > { %v1530_v20 = vrot.slane %v1529_v14, 2 }
 0x2d7   : > { %v1531_v19 = vmax.f32 %v1529_v14, %v1530_v20 }
 0x2d9   : > { %v1532_v15 = vrot.slane %v1531_v19, 1 }
 0x2db   : > { %v1533_v16 = vmax.f32 %v1531_v19, %v1532_v15 }
 0x2dd   : > { %v1552_v31 = vrot.slane %v1533_v16, 1 }
 0x2df   : > { %v1562_v22 = vsel %vm1561_vm7, %v1551_v18, %v1552_v31 }
 0x2e0   : > { %v1564_v59 = vsel %vm1563_vm8, %v1560_v8, %v1562_v22 }
 0x2e1   : > { %v1565_v23 = vsel %vm379_vm0, %v3082_v4, %v1564_v59 }
 0x2e2   : > { %1567 = vst [vmem:[%s311_s16] sm:$0xff] %v1565_v23 }
 0x2e3   : > { %2293 = shalt.err (!%p2290_p11)
}
 0x2e4   : > { %2120 = dma.vmem_to_hbm [thread:$0]  (%p2459_p3), %s1620_s24, 128, %s1622_s25, %s1605_s13  }
 0x2e5 PF: > { %p2137_p12 = scmp.ge.s32.totalorder %s2368_s28, 2  ;;  %s1633_s7 = sand.u32 1, %s2340_s21  }
 0x2e6   : > { %s1634_s19 = scalar_lea.sflag [#allocation4], %s1633_s7 }
 0x2e7   : > { %p2130_p13 = pnand %p2137_p12, %p2468_p8 }
 0x2e9   : > { %p2131_p0 = pneg %p2130_p13 }
 0x2eb   : > { %2335 = dma.done.wait (%p2131_p0), %s1634_s19, 128  }
 0x2ec   : > { %2337 = vsyncadd (%p2131_p0), %s1634_s19, 4294967168  ;;  %s21_s28 = sadd.s32 1, %s2368_s28   ;;  %s3151_s11 = sld [smem:[#allocation11_spill]] }
 0x2ed   : > { %p18_p1 = scmp.ge.s32.totalorder %s21_s28, 6   ;;  %s3152_s30 = sld [smem:[#allocation12_spill]] }
 0x2ee   : > { %s3153_s21 = smov %s2344_s22  ;;  %s3154_s22 = smov %s2348_s23 }
 0x2ef   : > { %s3155_s23 = smov %s2489_s20  ;;  %s3156_s24 = smov %s2360_s26 }
 0x2f0   : > { %s3157_s25 = smov %s2364_s27  ;;  %20 = sbr.rel (!%p18_p1) target bundleno = 7 (0x7), region = 96 }
 0x2f2   : > { %s3158_s26 = smov %s3151_s11 }
 0x2f3   : > { %s3159_s27 = smov %s3152_s30 }
 0x2f5   :  { %1640 = vsyncpa [#allocation3], 1 }
 0x2f6   :  { %1642 = vsyncpa [#allocation3 + $0x1], 1 }
 0x2f7   :  { %1643 = vsyncpa [#allocation6], 1 }
 0x2f8   :  { %1644 = vsyncpa [#allocation4], 1 }
 0x2f9   :  { %1646 = vsyncpa [#allocation4 + $0x1], 1 }

</bundles_post_ra>
